<compile_context>
chip_gen: v7x
topology: tpu7x:2x2x1
jax: 0.10.0
libtpu: 0.0.40
codegen_flags: <defaults>
</compile_context>

<pallas_src>
import jax
import jax.numpy as jnp
from jax.experimental import pallas as pl

EPS = 1e-5   # nn.LayerNorm default
LANE = 128   # lane width for the dense output slab


# ----------------------------------------------------------------------------- in-kernel helpers
def _layernorm(x, w, b):
    m = jnp.mean(x, axis=-1, keepdims=True)
    v = jnp.mean(jnp.square(x - m), axis=-1, keepdims=True)
    return (x - m) * jax.lax.rsqrt(v + EPS) * w + b


def _encoder_stack(x, refs):
    """L unrolled post-norm encoder layers (seq_len == 1 attention)."""
    wv, bv, wo, bo, ln1w, ln1b, w1, b1, w2, b2, ln2w, ln2b = refs
    L = wv.shape[0]
    for l in range(L):  # static unroll (L is small and known at trace time)
        # self-attention, seq_len == 1: attn(x) == out_proj(value_proj(x)) exactly
        v = jnp.dot(x, wv[l], preferred_element_type=jnp.float32) + bv[l]
        a = jnp.dot(v, wo[l], preferred_element_type=jnp.float32) + bo[l]
        x = _layernorm(x + a, ln1w[l], ln1b[l])
        # feed-forward (ReLU), post-norm; dropout = identity in eval
        h = jnp.maximum(
            jnp.dot(x, w1[l], preferred_element_type=jnp.float32) + b1[l], 0.0)
        f = jnp.dot(h, w2[l], preferred_element_type=jnp.float32) + b2[l]
        x = _layernorm(x + f, ln2w[l], ln2b[l])
    return x


# ----------------------------------------------------------------------------- fused whole-model kernel
# refs layout:
#   [0:2]   x_rs, x_se
#   [2:6]   rs_w, rs_b, se_w, se_b
#   [6:18]  rs transformer stack (12 arrays, leading dim L)
#   [18:30] se transformer stack (12 arrays, leading dim L)
#   [30:39] head: wrs_w(1,Drs), wrs_b(1,1), wse_w(1,Dse), wse_b(1,1),
#                 fc1_wrs, fc1_wse, fc1_b, fc2_w(ff,128 padded), fc2_b(1,128 padded)
#   [39]    out (B, 128) lane-dense slab
def fused_model_kernel(*refs):
    x_rs_ref, x_se_ref, rs_w, rs_b, se_w, se_b = refs[:6]
    trs_refs = refs[6:18]
    tse_refs = refs[18:30]
    (wrs_w, wrs_b, wse_w, wse_b,
     fc1_wrs, fc1_wse, fc1_b, fc2_w, fc2_b) = refs[30:39]
    out_ref = refs[39]

    # input embedding linears
    xr = (jnp.dot(x_rs_ref[...], rs_w[...], preferred_element_type=jnp.float32)
          + rs_b[...])
    xs = (jnp.dot(x_se_ref[...], se_w[...], preferred_element_type=jnp.float32)
          + se_b[...])

    # two independent transformer stacks (unrolled in-kernel)
    xr = _encoder_stack(xr, trs_refs)
    xs = _encoder_stack(xs, tse_refs)

    # sigmoid gates: N=1 matmul replaced by VPU multiply + lane reduction
    gr = jax.nn.sigmoid(
        jnp.sum(xr * wrs_w[...], axis=-1, keepdims=True) + wrs_b[...])
    gs = jax.nn.sigmoid(
        jnp.sum(xs * wse_w[...], axis=-1, keepdims=True) + wse_b[...])
    wr = xr * gr
    ws = xs * gs

    # fusion MLP; concat folded into the first matmul:
    #   concat(a, b) @ W1 == a @ W1[:Da] + b @ W1[Da:]
    h = (jnp.dot(wr, fc1_wrs[...], preferred_element_type=jnp.float32)
         + jnp.dot(ws, fc1_wse[...], preferred_element_type=jnp.float32)
         + fc1_b[...])
    h = jnp.maximum(h, 0.0)
    # fc2 weights are zero-padded to 128 output lanes -> unmasked lane-dense store
    out_ref[...] = (jnp.dot(h, fc2_w[...], preferred_element_type=jnp.float32)
                    + fc2_b[...])


_STACK_KEYS = ("wv", "bv", "wo", "bo", "ln1w", "ln1b",
               "w1", "b1", "w2", "b2", "ln2w", "ln2b")


def transformer_model(x_rs, x_se, params):
    B = x_rs.shape[0]
    head = params["head"]
    out_dim = head["fc2_w"].shape[1]

    # zero-pad fc2 output dim to a lane-dense 128-wide slab (safe: zero columns)
    pad = LANE - out_dim
    fc2_w = jnp.pad(head["fc2_w"], ((0, 0), (0, pad)))
    fc2_b = jnp.pad(head["fc2_b"], ((0, 0), (0, pad)))

    args = [x_rs, x_se,
            params["rs_w"], params["rs_b"], params["se_w"], params["se_b"]]
    args += [params["trs"][k] for k in _STACK_KEYS]
    args += [params["tse"][k] for k in _STACK_KEYS]
    args += [head["wrs_w"], head["wrs_b"], head["wse_w"], head["wse_b"],
             head["fc1_wrs"], head["fc1_wse"], head["fc1_b"], fc2_w, fc2_b]

    out = pl.pallas_call(
        fused_model_kernel,
        out_shape=jax.ShapeDtypeStruct((B, LANE), jnp.float32),
    )(*args)
    return out[:, :out_dim]


# ----------------------------------------------------------------------------- params (deterministic synthetic init)
def init_params(key, in_rs, in_se, d_rs, d_se, ff, L, out_dim):
    keys = iter(jax.random.split(key, 64))

    def rnd(shape, scale):
        return (scale * jax.random.normal(next(keys), shape)).astype(jnp.float32)

    def encoder_stack(d):
        return dict(
            wv=rnd((L, d, d), d ** -0.5), bv=rnd((L, 1, d), 0.02),
            wo=rnd((L, d, d), d ** -0.5), bo=rnd((L, 1, d), 0.02),
            ln1w=jnp.ones((L, 1, d), jnp.float32),
            ln1b=jnp.zeros((L, 1, d), jnp.float32),
            w1=rnd((L, d, ff), d ** -0.5), b1=rnd((L, 1, ff), 0.02),
            w2=rnd((L, ff, d), ff ** -0.5), b2=rnd((L, 1, d), 0.02),
            ln2w=jnp.ones((L, 1, d), jnp.float32),
            ln2b=jnp.zeros((L, 1, d), jnp.float32),
        )

    return dict(
        rs_w=rnd((in_rs, d_rs), in_rs ** -0.5), rs_b=rnd((1, d_rs), 0.02),
        se_w=rnd((in_se, d_se), in_se ** -0.5), se_b=rnd((1, d_se), 0.02),
        trs=encoder_stack(d_rs),
        tse=encoder_stack(d_se),
        head=dict(
            # gate weights stored as row vectors (1, D) for the VPU+reduce path
            wrs_w=rnd((1, d_rs), d_rs ** -0.5), wrs_b=rnd((1, 1), 0.02),
            wse_w=rnd((1, d_se), d_se ** -0.5), wse_b=rnd((1, 1), 0.02),
            fc1_wrs=rnd((d_rs, ff), (d_rs + d_se) ** -0.5),
            fc1_wse=rnd((d_se, ff), (d_rs + d_se) ** -0.5),
            fc1_b=rnd((1, ff), 0.02),
            fc2_w=rnd((ff, out_dim), ff ** -0.5),
            fc2_b=rnd((1, out_dim), 0.02),
        ),
    )


# ----------------------------------------------------------------------------- pure-JAX reference
def reference(x_rs, x_se, params):
    def ln(x, w, b):
        m = x.mean(-1, keepdims=True)
        v = ((x - m) ** 2).mean(-1, keepdims=True)
        return (x - m) / jnp.sqrt(v + EPS) * w + b

    def stack(x, p):
        for l in range(p["wv"].shape[0]):
            a = (x @ p["wv"][l] + p["bv"][l]) @ p["wo"][l] + p["bo"][l]
            x = ln(x + a, p["ln1w"][l], p["ln1b"][l])
            f = jnp.maximum(x @ p["w1"][l] + p["b1"][l], 0) @ p["w2"][l] + p["b2"][l]
            x = ln(x + f, p["ln2w"][l], p["ln2b"][l])
        return x

    xr = stack(x_rs @ params["rs_w"] + params["rs_b"], params["trs"])
    xs = stack(x_se @ params["se_w"] + params["se_b"], params["tse"])
    h = params["head"]
    gr = jax.nn.sigmoid(xr @ h["wrs_w"].T + h["wrs_b"])
    gs = jax.nn.sigmoid(xs @ h["wse_w"].T + h["wse_b"])
    fused = jnp.concatenate([xr * gr, xs * gs], axis=1)
    fc1_w = jnp.concatenate([h["fc1_wrs"], h["fc1_wse"]], axis=0)
    hid = jnp.maximum(fused @ fc1_w + h["fc1_b"], 0)
    return hid @ h["fc2_w"] + h["fc2_b"]


# ----------------------------------------------------------------------------- main
if __name__ == "__main__":
    B = 8
    input_dim_rs, input_dim_se = 16, 12
    num_heads = 4
    nh_rs = min(num_heads, input_dim_rs)
    nh_se = min(num_heads, input_dim_se)
    d_rs = input_dim_rs // nh_rs * nh_rs   # 16
    d_se = input_dim_se // nh_se * nh_se   # 12
    ff_hidden, num_layers, output_dim = 32, 2, 3

    key = jax.random.PRNGKey(0)
    kx, kp = jax.random.split(key)
    x_rs = jax.random.normal(jax.random.fold_in(kx, 0), (B, input_dim_rs), jnp.float32)
    x_se = jax.random.normal(jax.random.fold_in(kx, 1), (B, input_dim_se), jnp.float32)
    params = init_params(kp, input_dim_rs, input_dim_se, d_rs, d_se,
                         ff_hidden, num_layers, output_dim)

    out = jax.block_until_ready(transformer_model(x_rs, x_se, params))
    ref = reference(x_rs, x_se, params)

    assert out.shape == (B, output_dim)
    assert jnp.allclose(out, ref, atol=1e-4, rtol=1e-4), float(jnp.max(jnp.abs(out - ref)))
    print("KERNEL_OK")
</pallas_src>

<mosaic_0001>
module attributes {stable_mosaic.version = 11 : i64} {
  func.func @fused_model_kernel(%arg0: memref<8x16xf32, #tpu.memory_space<vmem>>, %arg1: memref<8x12xf32, #tpu.memory_space<vmem>>, %arg2: memref<16x16xf32, #tpu.memory_space<vmem>>, %arg3: memref<1x16xf32, #tpu.memory_space<vmem>>, %arg4: memref<12x12xf32, #tpu.memory_space<vmem>>, %arg5: memref<1x12xf32, #tpu.memory_space<vmem>>, %arg6: memref<2x16x16xf32, #tpu.memory_space<vmem>>, %arg7: memref<2x1x16xf32, #tpu.memory_space<vmem>>, %arg8: memref<2x16x16xf32, #tpu.memory_space<vmem>>, %arg9: memref<2x1x16xf32, #tpu.memory_space<vmem>>, %arg10: memref<2x1x16xf32, #tpu.memory_space<vmem>>, %arg11: memref<2x1x16xf32, #tpu.memory_space<vmem>>, %arg12: memref<2x16x32xf32, #tpu.memory_space<vmem>>, %arg13: memref<2x1x32xf32, #tpu.memory_space<vmem>>, %arg14: memref<2x32x16xf32, #tpu.memory_space<vmem>>, %arg15: memref<2x1x16xf32, #tpu.memory_space<vmem>>, %arg16: memref<2x1x16xf32, #tpu.memory_space<vmem>>, %arg17: memref<2x1x16xf32, #tpu.memory_space<vmem>>, %arg18: memref<2x12x12xf32, #tpu.memory_space<vmem>>, %arg19: memref<2x1x12xf32, #tpu.memory_space<vmem>>, %arg20: memref<2x12x12xf32, #tpu.memory_space<vmem>>, %arg21: memref<2x1x12xf32, #tpu.memory_space<vmem>>, %arg22: memref<2x1x12xf32, #tpu.memory_space<vmem>>, %arg23: memref<2x1x12xf32, #tpu.memory_space<vmem>>, %arg24: memref<2x12x32xf32, #tpu.memory_space<vmem>>, %arg25: memref<2x1x32xf32, #tpu.memory_space<vmem>>, %arg26: memref<2x32x12xf32, #tpu.memory_space<vmem>>, %arg27: memref<2x1x12xf32, #tpu.memory_space<vmem>>, %arg28: memref<2x1x12xf32, #tpu.memory_space<vmem>>, %arg29: memref<2x1x12xf32, #tpu.memory_space<vmem>>, %arg30: memref<1x16xf32, #tpu.memory_space<vmem>>, %arg31: memref<1x1xf32, #tpu.memory_space<vmem>>, %arg32: memref<1x12xf32, #tpu.memory_space<vmem>>, %arg33: memref<1x1xf32, #tpu.memory_space<vmem>>, %arg34: memref<16x32xf32, #tpu.memory_space<vmem>>, %arg35: memref<12x32xf32, #tpu.memory_space<vmem>>, %arg36: memref<1x32xf32, #tpu.memory_space<vmem>>, %arg37: memref<32x128xf32, #tpu.memory_space<vmem>>, %arg38: memref<1x128xf32, #tpu.memory_space<vmem>>, %arg39: memref<8x128xf32, #tpu.memory_space<vmem>>) attributes {dimension_semantics = [], scalar_prefetch = 0 : i64, scratch_operands = 0 : i64, tpu.core_type = #tpu.core_type<tc>} {
    %c0 = arith.constant 0 : index
    %c0_0 = arith.constant 0 : index
    %0 = vector.load %arg0[%c0, %c0_0] : memref<8x16xf32, #tpu.memory_space<vmem>>, vector<8x16xf32>
    %c0_1 = arith.constant 0 : index
    %c0_2 = arith.constant 0 : index
    %1 = vector.load %arg2[%c0_1, %c0_2] : memref<16x16xf32, #tpu.memory_space<vmem>>, vector<16x16xf32>
    %cst = arith.constant dense<0.000000e+00> : vector<8x16xf32>
    %2 = tpu.matmul %0, %1, %cst {dimension_numbers = #tpu.dot_dimension_numbers<[1], [0], [0], [1], [0, 0, 1, 1], [], []>} : vector<8x16xf32>, vector<16x16xf32>, vector<8x16xf32> -> vector<8x16xf32>
    %c0_3 = arith.constant 0 : index
    %c0_4 = arith.constant 0 : index
    %3 = vector.load %arg3[%c0_3, %c0_4] : memref<1x16xf32, #tpu.memory_space<vmem>>, vector<1x16xf32>
    %4 = vector.broadcast %3 : vector<1x16xf32> to vector<8x16xf32>
    %5 = arith.addf %2, %4 : vector<8x16xf32>
    %c0_5 = arith.constant 0 : index
    %c0_6 = arith.constant 0 : index
    %6 = vector.load %arg1[%c0_5, %c0_6] : memref<8x12xf32, #tpu.memory_space<vmem>>, vector<8x12xf32>
    %c0_7 = arith.constant 0 : index
    %c0_8 = arith.constant 0 : index
    %7 = vector.load %arg4[%c0_7, %c0_8] : memref<12x12xf32, #tpu.memory_space<vmem>>, vector<12x12xf32>
    %cst_9 = arith.constant dense<0.000000e+00> : vector<8x12xf32>
    %8 = tpu.matmul %6, %7, %cst_9 {dimension_numbers = #tpu.dot_dimension_numbers<[1], [0], [0], [1], [0, 0, 1, 1], [], []>} : vector<8x12xf32>, vector<12x12xf32>, vector<8x12xf32> -> vector<8x12xf32>
    %c0_10 = arith.constant 0 : index
    %c0_11 = arith.constant 0 : index
    %9 = vector.load %arg5[%c0_10, %c0_11] : memref<1x12xf32, #tpu.memory_space<vmem>>, vector<1x12xf32>
    %10 = vector.broadcast %9 : vector<1x12xf32> to vector<8x12xf32>
    %11 = arith.addf %8, %10 : vector<8x12xf32>
    %c0_12 = arith.constant 0 : index
    %c0_13 = arith.constant 0 : index
    %c0_14 = arith.constant 0 : index
    %12 = vector.load %arg6[%c0_12, %c0_13, %c0_14] : memref<2x16x16xf32, #tpu.memory_space<vmem>>, vector<1x16x16xf32>
    %13 = vector.shape_cast %12 : vector<1x16x16xf32> to vector<16x16xf32>
    %cst_15 = arith.constant dense<0.000000e+00> : vector<8x16xf32>
    %14 = tpu.matmul %5, %13, %cst_15 {dimension_numbers = #tpu.dot_dimension_numbers<[1], [0], [0], [1], [0, 0, 1, 1], [], []>} : vector<8x16xf32>, vector<16x16xf32>, vector<8x16xf32> -> vector<8x16xf32>
    %c0_16 = arith.constant 0 : index
    %c0_17 = arith.constant 0 : index
    %c0_18 = arith.constant 0 : index
    %15 = vector.load %arg7[%c0_16, %c0_17, %c0_18] : memref<2x1x16xf32, #tpu.memory_space<vmem>>, vector<1x1x16xf32>
    %16 = vector.shape_cast %15 : vector<1x1x16xf32> to vector<1x16xf32>
    %17 = vector.broadcast %16 : vector<1x16xf32> to vector<8x16xf32>
    %18 = arith.addf %14, %17 : vector<8x16xf32>
    %c0_19 = arith.constant 0 : index
    %c0_20 = arith.constant 0 : index
    %c0_21 = arith.constant 0 : index
    %19 = vector.load %arg8[%c0_19, %c0_20, %c0_21] : memref<2x16x16xf32, #tpu.memory_space<vmem>>, vector<1x16x16xf32>
    %20 = vector.shape_cast %19 : vector<1x16x16xf32> to vector<16x16xf32>
    %cst_22 = arith.constant dense<0.000000e+00> : vector<8x16xf32>
    %21 = tpu.matmul %18, %20, %cst_22 {dimension_numbers = #tpu.dot_dimension_numbers<[1], [0], [0], [1], [0, 0, 1, 1], [], []>} : vector<8x16xf32>, vector<16x16xf32>, vector<8x16xf32> -> vector<8x16xf32>
    %c0_23 = arith.constant 0 : index
    %c0_24 = arith.constant 0 : index
    %c0_25 = arith.constant 0 : index
    %22 = vector.load %arg9[%c0_23, %c0_24, %c0_25] : memref<2x1x16xf32, #tpu.memory_space<vmem>>, vector<1x1x16xf32>
    %23 = vector.shape_cast %22 : vector<1x1x16xf32> to vector<1x16xf32>
    %24 = vector.broadcast %23 : vector<1x16xf32> to vector<8x16xf32>
    %25 = arith.addf %21, %24 : vector<8x16xf32>
    %26 = arith.addf %5, %25 : vector<8x16xf32>
    %c0_26 = arith.constant 0 : index
    %c0_27 = arith.constant 0 : index
    %c0_28 = arith.constant 0 : index
    %27 = vector.load %arg10[%c0_26, %c0_27, %c0_28] : memref<2x1x16xf32, #tpu.memory_space<vmem>>, vector<1x1x16xf32>
    %28 = vector.shape_cast %27 : vector<1x1x16xf32> to vector<1x16xf32>
    %c0_29 = arith.constant 0 : index
    %c0_30 = arith.constant 0 : index
    %c0_31 = arith.constant 0 : index
    %29 = vector.load %arg11[%c0_29, %c0_30, %c0_31] : memref<2x1x16xf32, #tpu.memory_space<vmem>>, vector<1x1x16xf32>
    %30 = vector.shape_cast %29 : vector<1x1x16xf32> to vector<1x16xf32>
    %cst_32 = arith.constant dense<0.000000e+00> : vector<8xf32>
    %31 = vector.multi_reduction <add>, %26, %cst_32 [1] : vector<8x16xf32> to vector<8xf32>
    %32 = vector.shape_cast %31 : vector<8xf32> to vector<8x1xf32>
    %cst_33 = arith.constant 1.600000e+01 : f32
    %33 = vector.broadcast %cst_33 : f32 to vector<8x1xf32>
    %34 = arith.divf %32, %33 : vector<8x1xf32>
    %35 = vector.broadcast %34 : vector<8x1xf32> to vector<8x16xf32>
    %36 = arith.subf %26, %35 : vector<8x16xf32>
    %37 = arith.mulf %36, %36 : vector<8x16xf32>
    %cst_34 = arith.constant dense<0.000000e+00> : vector<8xf32>
    %38 = vector.multi_reduction <add>, %37, %cst_34 [1] : vector<8x16xf32> to vector<8xf32>
    %39 = vector.shape_cast %38 : vector<8xf32> to vector<8x1xf32>
    %cst_35 = arith.constant 1.600000e+01 : f32
    %40 = vector.broadcast %cst_35 : f32 to vector<8x1xf32>
    %41 = arith.divf %39, %40 : vector<8x1xf32>
    %42 = vector.broadcast %34 : vector<8x1xf32> to vector<8x16xf32>
    %43 = arith.subf %26, %42 : vector<8x16xf32>
    %cst_36 = arith.constant 9.99999974E-6 : f32
    %44 = vector.broadcast %cst_36 : f32 to vector<8x1xf32>
    %45 = arith.addf %41, %44 : vector<8x1xf32>
    %46 = math.rsqrt %45 : vector<8x1xf32>
    %47 = vector.broadcast %46 : vector<8x1xf32> to vector<8x16xf32>
    %48 = arith.mulf %43, %47 : vector<8x16xf32>
    %49 = vector.broadcast %28 : vector<1x16xf32> to vector<8x16xf32>
    %50 = arith.mulf %48, %49 : vector<8x16xf32>
    %51 = vector.broadcast %30 : vector<1x16xf32> to vector<8x16xf32>
    %52 = arith.addf %50, %51 : vector<8x16xf32>
    %c0_37 = arith.constant 0 : index
    %c0_38 = arith.constant 0 : index
    %c0_39 = arith.constant 0 : index
    %53 = vector.load %arg12[%c0_37, %c0_38, %c0_39] : memref<2x16x32xf32, #tpu.memory_space<vmem>>, vector<1x16x32xf32>
    %54 = vector.shape_cast %53 : vector<1x16x32xf32> to vector<16x32xf32>
    %cst_40 = arith.constant dense<0.000000e+00> : vector<8x32xf32>
    %55 = tpu.matmul %52, %54, %cst_40 {dimension_numbers = #tpu.dot_dimension_numbers<[1], [0], [0], [1], [0, 0, 1, 1], [], []>} : vector<8x16xf32>, vector<16x32xf32>, vector<8x32xf32> -> vector<8x32xf32>
    %c0_41 = arith.constant 0 : index
    %c0_42 = arith.constant 0 : index
    %c0_43 = arith.constant 0 : index
    %56 = vector.load %arg13[%c0_41, %c0_42, %c0_43] : memref<2x1x32xf32, #tpu.memory_space<vmem>>, vector<1x1x32xf32>
    %57 = vector.shape_cast %56 : vector<1x1x32xf32> to vector<1x32xf32>
    %58 = vector.broadcast %57 : vector<1x32xf32> to vector<8x32xf32>
    %59 = arith.addf %55, %58 : vector<8x32xf32>
    %cst_44 = arith.constant 0.000000e+00 : f32
    %60 = vector.broadcast %cst_44 : f32 to vector<8x32xf32>
    %61 = arith.maximumf %59, %60 : vector<8x32xf32>
    %c0_45 = arith.constant 0 : index
    %c0_46 = arith.constant 0 : index
    %c0_47 = arith.constant 0 : index
    %62 = vector.load %arg14[%c0_45, %c0_46, %c0_47] : memref<2x32x16xf32, #tpu.memory_space<vmem>>, vector<1x32x16xf32>
    %63 = vector.shape_cast %62 : vector<1x32x16xf32> to vector<32x16xf32>
    %cst_48 = arith.constant dense<0.000000e+00> : vector<8x16xf32>
    %64 = tpu.matmul %61, %63, %cst_48 {dimension_numbers = #tpu.dot_dimension_numbers<[1], [0], [0], [1], [0, 0, 1, 1], [], []>} : vector<8x32xf32>, vector<32x16xf32>, vector<8x16xf32> -> vector<8x16xf32>
    %c0_49 = arith.constant 0 : index
    %c0_50 = arith.constant 0 : index
    %c0_51 = arith.constant 0 : index
    %65 = vector.load %arg15[%c0_49, %c0_50, %c0_51] : memref<2x1x16xf32, #tpu.memory_space<vmem>>, vector<1x1x16xf32>
    %66 = vector.shape_cast %65 : vector<1x1x16xf32> to vector<1x16xf32>
    %67 = vector.broadcast %66 : vector<1x16xf32> to vector<8x16xf32>
    %68 = arith.addf %64, %67 : vector<8x16xf32>
    %69 = arith.addf %52, %68 : vector<8x16xf32>
    %c0_52 = arith.constant 0 : index
    %c0_53 = arith.constant 0 : index
    %c0_54 = arith.constant 0 : index
    %70 = vector.load %arg16[%c0_52, %c0_53, %c0_54] : memref<2x1x16xf32, #tpu.memory_space<vmem>>, vector<1x1x16xf32>
    %71 = vector.shape_cast %70 : vector<1x1x16xf32> to vector<1x16xf32>
    %c0_55 = arith.constant 0 : index
    %c0_56 = arith.constant 0 : index
    %c0_57 = arith.constant 0 : index
    %72 = vector.load %arg17[%c0_55, %c0_56, %c0_57] : memref<2x1x16xf32, #tpu.memory_space<vmem>>, vector<1x1x16xf32>
    %73 = vector.shape_cast %72 : vector<1x1x16xf32> to vector<1x16xf32>
    %cst_58 = arith.constant dense<0.000000e+00> : vector<8xf32>
    %74 = vector.multi_reduction <add>, %69, %cst_58 [1] : vector<8x16xf32> to vector<8xf32>
    %75 = vector.shape_cast %74 : vector<8xf32> to vector<8x1xf32>
    %cst_59 = arith.constant 1.600000e+01 : f32
    %76 = vector.broadcast %cst_59 : f32 to vector<8x1xf32>
    %77 = arith.divf %75, %76 : vector<8x1xf32>
    %78 = vector.broadcast %77 : vector<8x1xf32> to vector<8x16xf32>
    %79 = arith.subf %69, %78 : vector<8x16xf32>
    %80 = arith.mulf %79, %79 : vector<8x16xf32>
    %cst_60 = arith.constant dense<0.000000e+00> : vector<8xf32>
    %81 = vector.multi_reduction <add>, %80, %cst_60 [1] : vector<8x16xf32> to vector<8xf32>
    %82 = vector.shape_cast %81 : vector<8xf32> to vector<8x1xf32>
    %cst_61 = arith.constant 1.600000e+01 : f32
    %83 = vector.broadcast %cst_61 : f32 to vector<8x1xf32>
    %84 = arith.divf %82, %83 : vector<8x1xf32>
    %85 = vector.broadcast %77 : vector<8x1xf32> to vector<8x16xf32>
    %86 = arith.subf %69, %85 : vector<8x16xf32>
    %cst_62 = arith.constant 9.99999974E-6 : f32
    %87 = vector.broadcast %cst_62 : f32 to vector<8x1xf32>
    %88 = arith.addf %84, %87 : vector<8x1xf32>
    %89 = math.rsqrt %88 : vector<8x1xf32>
    %90 = vector.broadcast %89 : vector<8x1xf32> to vector<8x16xf32>
    %91 = arith.mulf %86, %90 : vector<8x16xf32>
    %92 = vector.broadcast %71 : vector<1x16xf32> to vector<8x16xf32>
    %93 = arith.mulf %91, %92 : vector<8x16xf32>
    %94 = vector.broadcast %73 : vector<1x16xf32> to vector<8x16xf32>
    %95 = arith.addf %93, %94 : vector<8x16xf32>
    %c1 = arith.constant 1 : index
    %c0_63 = arith.constant 0 : index
    %c0_64 = arith.constant 0 : index
    %96 = vector.load %arg6[%c1, %c0_63, %c0_64] : memref<2x16x16xf32, #tpu.memory_space<vmem>>, vector<1x16x16xf32>
    %97 = vector.shape_cast %96 : vector<1x16x16xf32> to vector<16x16xf32>
    %cst_65 = arith.constant dense<0.000000e+00> : vector<8x16xf32>
    %98 = tpu.matmul %95, %97, %cst_65 {dimension_numbers = #tpu.dot_dimension_numbers<[1], [0], [0], [1], [0, 0, 1, 1], [], []>} : vector<8x16xf32>, vector<16x16xf32>, vector<8x16xf32> -> vector<8x16xf32>
    %c1_66 = arith.constant 1 : index
    %c0_67 = arith.constant 0 : index
    %c0_68 = arith.constant 0 : index
    %99 = vector.load %arg7[%c1_66, %c0_67, %c0_68] : memref<2x1x16xf32, #tpu.memory_space<vmem>>, vector<1x1x16xf32>
    %100 = vector.shape_cast %99 : vector<1x1x16xf32> to vector<1x16xf32>
    %101 = vector.broadcast %100 : vector<1x16xf32> to vector<8x16xf32>
    %102 = arith.addf %98, %101 : vector<8x16xf32>
    %c1_69 = arith.constant 1 : index
    %c0_70 = arith.constant 0 : index
    %c0_71 = arith.constant 0 : index
    %103 = vector.load %arg8[%c1_69, %c0_70, %c0_71] : memref<2x16x16xf32, #tpu.memory_space<vmem>>, vector<1x16x16xf32>
    %104 = vector.shape_cast %103 : vector<1x16x16xf32> to vector<16x16xf32>
    %cst_72 = arith.constant dense<0.000000e+00> : vector<8x16xf32>
    %105 = tpu.matmul %102, %104, %cst_72 {dimension_numbers = #tpu.dot_dimension_numbers<[1], [0], [0], [1], [0, 0, 1, 1], [], []>} : vector<8x16xf32>, vector<16x16xf32>, vector<8x16xf32> -> vector<8x16xf32>
    %c1_73 = arith.constant 1 : index
    %c0_74 = arith.constant 0 : index
    %c0_75 = arith.constant 0 : index
    %106 = vector.load %arg9[%c1_73, %c0_74, %c0_75] : memref<2x1x16xf32, #tpu.memory_space<vmem>>, vector<1x1x16xf32>
    %107 = vector.shape_cast %106 : vector<1x1x16xf32> to vector<1x16xf32>
    %108 = vector.broadcast %107 : vector<1x16xf32> to vector<8x16xf32>
    %109 = arith.addf %105, %108 : vector<8x16xf32>
    %110 = arith.addf %95, %109 : vector<8x16xf32>
    %c1_76 = arith.constant 1 : index
    %c0_77 = arith.constant 0 : index
    %c0_78 = arith.constant 0 : index
    %111 = vector.load %arg10[%c1_76, %c0_77, %c0_78] : memref<2x1x16xf32, #tpu.memory_space<vmem>>, vector<1x1x16xf32>
    %112 = vector.shape_cast %111 : vector<1x1x16xf32> to vector<1x16xf32>
    %c1_79 = arith.constant 1 : index
    %c0_80 = arith.constant 0 : index
    %c0_81 = arith.constant 0 : index
    %113 = vector.load %arg11[%c1_79, %c0_80, %c0_81] : memref<2x1x16xf32, #tpu.memory_space<vmem>>, vector<1x1x16xf32>
    %114 = vector.shape_cast %113 : vector<1x1x16xf32> to vector<1x16xf32>
    %cst_82 = arith.constant dense<0.000000e+00> : vector<8xf32>
    %115 = vector.multi_reduction <add>, %110, %cst_82 [1] : vector<8x16xf32> to vector<8xf32>
    %116 = vector.shape_cast %115 : vector<8xf32> to vector<8x1xf32>
    %cst_83 = arith.constant 1.600000e+01 : f32
    %117 = vector.broadcast %cst_83 : f32 to vector<8x1xf32>
    %118 = arith.divf %116, %117 : vector<8x1xf32>
    %119 = vector.broadcast %118 : vector<8x1xf32> to vector<8x16xf32>
    %120 = arith.subf %110, %119 : vector<8x16xf32>
    %121 = arith.mulf %120, %120 : vector<8x16xf32>
    %cst_84 = arith.constant dense<0.000000e+00> : vector<8xf32>
    %122 = vector.multi_reduction <add>, %121, %cst_84 [1] : vector<8x16xf32> to vector<8xf32>
    %123 = vector.shape_cast %122 : vector<8xf32> to vector<8x1xf32>
    %cst_85 = arith.constant 1.600000e+01 : f32
    %124 = vector.broadcast %cst_85 : f32 to vector<8x1xf32>
    %125 = arith.divf %123, %124 : vector<8x1xf32>
    %126 = vector.broadcast %118 : vector<8x1xf32> to vector<8x16xf32>
    %127 = arith.subf %110, %126 : vector<8x16xf32>
    %cst_86 = arith.constant 9.99999974E-6 : f32
    %128 = vector.broadcast %cst_86 : f32 to vector<8x1xf32>
    %129 = arith.addf %125, %128 : vector<8x1xf32>
    %130 = math.rsqrt %129 : vector<8x1xf32>
    %131 = vector.broadcast %130 : vector<8x1xf32> to vector<8x16xf32>
    %132 = arith.mulf %127, %131 : vector<8x16xf32>
    %133 = vector.broadcast %112 : vector<1x16xf32> to vector<8x16xf32>
    %134 = arith.mulf %132, %133 : vector<8x16xf32>
    %135 = vector.broadcast %114 : vector<1x16xf32> to vector<8x16xf32>
    %136 = arith.addf %134, %135 : vector<8x16xf32>
    %c1_87 = arith.constant 1 : index
    %c0_88 = arith.constant 0 : index
    %c0_89 = arith.constant 0 : index
    %137 = vector.load %arg12[%c1_87, %c0_88, %c0_89] : memref<2x16x32xf32, #tpu.memory_space<vmem>>, vector<1x16x32xf32>
    %138 = vector.shape_cast %137 : vector<1x16x32xf32> to vector<16x32xf32>
    %cst_90 = arith.constant dense<0.000000e+00> : vector<8x32xf32>
    %139 = tpu.matmul %136, %138, %cst_90 {dimension_numbers = #tpu.dot_dimension_numbers<[1], [0], [0], [1], [0, 0, 1, 1], [], []>} : vector<8x16xf32>, vector<16x32xf32>, vector<8x32xf32> -> vector<8x32xf32>
    %c1_91 = arith.constant 1 : index
    %c0_92 = arith.constant 0 : index
    %c0_93 = arith.constant 0 : index
    %140 = vector.load %arg13[%c1_91, %c0_92, %c0_93] : memref<2x1x32xf32, #tpu.memory_space<vmem>>, vector<1x1x32xf32>
    %141 = vector.shape_cast %140 : vector<1x1x32xf32> to vector<1x32xf32>
    %142 = vector.broadcast %141 : vector<1x32xf32> to vector<8x32xf32>
    %143 = arith.addf %139, %142 : vector<8x32xf32>
    %cst_94 = arith.constant 0.000000e+00 : f32
    %144 = vector.broadcast %cst_94 : f32 to vector<8x32xf32>
    %145 = arith.maximumf %143, %144 : vector<8x32xf32>
    %c1_95 = arith.constant 1 : index
    %c0_96 = arith.constant 0 : index
    %c0_97 = arith.constant 0 : index
    %146 = vector.load %arg14[%c1_95, %c0_96, %c0_97] : memref<2x32x16xf32, #tpu.memory_space<vmem>>, vector<1x32x16xf32>
    %147 = vector.shape_cast %146 : vector<1x32x16xf32> to vector<32x16xf32>
    %cst_98 = arith.constant dense<0.000000e+00> : vector<8x16xf32>
    %148 = tpu.matmul %145, %147, %cst_98 {dimension_numbers = #tpu.dot_dimension_numbers<[1], [0], [0], [1], [0, 0, 1, 1], [], []>} : vector<8x32xf32>, vector<32x16xf32>, vector<8x16xf32> -> vector<8x16xf32>
    %c1_99 = arith.constant 1 : index
    %c0_100 = arith.constant 0 : index
    %c0_101 = arith.constant 0 : index
    %149 = vector.load %arg15[%c1_99, %c0_100, %c0_101] : memref<2x1x16xf32, #tpu.memory_space<vmem>>, vector<1x1x16xf32>
    %150 = vector.shape_cast %149 : vector<1x1x16xf32> to vector<1x16xf32>
    %151 = vector.broadcast %150 : vector<1x16xf32> to vector<8x16xf32>
    %152 = arith.addf %148, %151 : vector<8x16xf32>
    %153 = arith.addf %136, %152 : vector<8x16xf32>
    %c1_102 = arith.constant 1 : index
    %c0_103 = arith.constant 0 : index
    %c0_104 = arith.constant 0 : index
    %154 = vector.load %arg16[%c1_102, %c0_103, %c0_104] : memref<2x1x16xf32, #tpu.memory_space<vmem>>, vector<1x1x16xf32>
    %155 = vector.shape_cast %154 : vector<1x1x16xf32> to vector<1x16xf32>
    %c1_105 = arith.constant 1 : index
    %c0_106 = arith.constant 0 : index
    %c0_107 = arith.constant 0 : index
    %156 = vector.load %arg17[%c1_105, %c0_106, %c0_107] : memref<2x1x16xf32, #tpu.memory_space<vmem>>, vector<1x1x16xf32>
    %157 = vector.shape_cast %156 : vector<1x1x16xf32> to vector<1x16xf32>
    %cst_108 = arith.constant dense<0.000000e+00> : vector<8xf32>
    %158 = vector.multi_reduction <add>, %153, %cst_108 [1] : vector<8x16xf32> to vector<8xf32>
    %159 = vector.shape_cast %158 : vector<8xf32> to vector<8x1xf32>
    %cst_109 = arith.constant 1.600000e+01 : f32
    %160 = vector.broadcast %cst_109 : f32 to vector<8x1xf32>
    %161 = arith.divf %159, %160 : vector<8x1xf32>
    %162 = vector.broadcast %161 : vector<8x1xf32> to vector<8x16xf32>
    %163 = arith.subf %153, %162 : vector<8x16xf32>
    %164 = arith.mulf %163, %163 : vector<8x16xf32>
    %cst_110 = arith.constant dense<0.000000e+00> : vector<8xf32>
    %165 = vector.multi_reduction <add>, %164, %cst_110 [1] : vector<8x16xf32> to vector<8xf32>
    %166 = vector.shape_cast %165 : vector<8xf32> to vector<8x1xf32>
    %cst_111 = arith.constant 1.600000e+01 : f32
    %167 = vector.broadcast %cst_111 : f32 to vector<8x1xf32>
    %168 = arith.divf %166, %167 : vector<8x1xf32>
    %169 = vector.broadcast %161 : vector<8x1xf32> to vector<8x16xf32>
    %170 = arith.subf %153, %169 : vector<8x16xf32>
    %cst_112 = arith.constant 9.99999974E-6 : f32
    %171 = vector.broadcast %cst_112 : f32 to vector<8x1xf32>
    %172 = arith.addf %168, %171 : vector<8x1xf32>
    %173 = math.rsqrt %172 : vector<8x1xf32>
    %174 = vector.broadcast %173 : vector<8x1xf32> to vector<8x16xf32>
    %175 = arith.mulf %170, %174 : vector<8x16xf32>
    %176 = vector.broadcast %155 : vector<1x16xf32> to vector<8x16xf32>
    %177 = arith.mulf %175, %176 : vector<8x16xf32>
    %178 = vector.broadcast %157 : vector<1x16xf32> to vector<8x16xf32>
    %179 = arith.addf %177, %178 : vector<8x16xf32>
    %c0_113 = arith.constant 0 : index
    %c0_114 = arith.constant 0 : index
    %c0_115 = arith.constant 0 : index
    %180 = vector.load %arg18[%c0_113, %c0_114, %c0_115] : memref<2x12x12xf32, #tpu.memory_space<vmem>>, vector<1x12x12xf32>
    %181 = vector.shape_cast %180 : vector<1x12x12xf32> to vector<12x12xf32>
    %cst_116 = arith.constant dense<0.000000e+00> : vector<8x12xf32>
    %182 = tpu.matmul %11, %181, %cst_116 {dimension_numbers = #tpu.dot_dimension_numbers<[1], [0], [0], [1], [0, 0, 1, 1], [], []>} : vector<8x12xf32>, vector<12x12xf32>, vector<8x12xf32> -> vector<8x12xf32>
    %c0_117 = arith.constant 0 : index
    %c0_118 = arith.constant 0 : index
    %c0_119 = arith.constant 0 : index
    %183 = vector.load %arg19[%c0_117, %c0_118, %c0_119] : memref<2x1x12xf32, #tpu.memory_space<vmem>>, vector<1x1x12xf32>
    %184 = vector.shape_cast %183 : vector<1x1x12xf32> to vector<1x12xf32>
    %185 = vector.broadcast %184 : vector<1x12xf32> to vector<8x12xf32>
    %186 = arith.addf %182, %185 : vector<8x12xf32>
    %c0_120 = arith.constant 0 : index
    %c0_121 = arith.constant 0 : index
    %c0_122 = arith.constant 0 : index
    %187 = vector.load %arg20[%c0_120, %c0_121, %c0_122] : memref<2x12x12xf32, #tpu.memory_space<vmem>>, vector<1x12x12xf32>
    %188 = vector.shape_cast %187 : vector<1x12x12xf32> to vector<12x12xf32>
    %cst_123 = arith.constant dense<0.000000e+00> : vector<8x12xf32>
    %189 = tpu.matmul %186, %188, %cst_123 {dimension_numbers = #tpu.dot_dimension_numbers<[1], [0], [0], [1], [0, 0, 1, 1], [], []>} : vector<8x12xf32>, vector<12x12xf32>, vector<8x12xf32> -> vector<8x12xf32>
    %c0_124 = arith.constant 0 : index
    %c0_125 = arith.constant 0 : index
    %c0_126 = arith.constant 0 : index
    %190 = vector.load %arg21[%c0_124, %c0_125, %c0_126] : memref<2x1x12xf32, #tpu.memory_space<vmem>>, vector<1x1x12xf32>
    %191 = vector.shape_cast %190 : vector<1x1x12xf32> to vector<1x12xf32>
    %192 = vector.broadcast %191 : vector<1x12xf32> to vector<8x12xf32>
    %193 = arith.addf %189, %192 : vector<8x12xf32>
    %194 = arith.addf %11, %193 : vector<8x12xf32>
    %c0_127 = arith.constant 0 : index
    %c0_128 = arith.constant 0 : index
    %c0_129 = arith.constant 0 : index
    %195 = vector.load %arg22[%c0_127, %c0_128, %c0_129] : memref<2x1x12xf32, #tpu.memory_space<vmem>>, vector<1x1x12xf32>
    %196 = vector.shape_cast %195 : vector<1x1x12xf32> to vector<1x12xf32>
    %c0_130 = arith.constant 0 : index
    %c0_131 = arith.constant 0 : index
    %c0_132 = arith.constant 0 : index
    %197 = vector.load %arg23[%c0_130, %c0_131, %c0_132] : memref<2x1x12xf32, #tpu.memory_space<vmem>>, vector<1x1x12xf32>
    %198 = vector.shape_cast %197 : vector<1x1x12xf32> to vector<1x12xf32>
    %cst_133 = arith.constant dense<0.000000e+00> : vector<8xf32>
    %199 = vector.multi_reduction <add>, %194, %cst_133 [1] : vector<8x12xf32> to vector<8xf32>
    %200 = vector.shape_cast %199 : vector<8xf32> to vector<8x1xf32>
    %cst_134 = arith.constant 1.200000e+01 : f32
    %201 = vector.broadcast %cst_134 : f32 to vector<8x1xf32>
    %202 = arith.divf %200, %201 : vector<8x1xf32>
    %203 = vector.broadcast %202 : vector<8x1xf32> to vector<8x12xf32>
    %204 = arith.subf %194, %203 : vector<8x12xf32>
    %205 = arith.mulf %204, %204 : vector<8x12xf32>
    %cst_135 = arith.constant dense<0.000000e+00> : vector<8xf32>
    %206 = vector.multi_reduction <add>, %205, %cst_135 [1] : vector<8x12xf32> to vector<8xf32>
    %207 = vector.shape_cast %206 : vector<8xf32> to vector<8x1xf32>
    %cst_136 = arith.constant 1.200000e+01 : f32
    %208 = vector.broadcast %cst_136 : f32 to vector<8x1xf32>
    %209 = arith.divf %207, %208 : vector<8x1xf32>
    %210 = vector.broadcast %202 : vector<8x1xf32> to vector<8x12xf32>
    %211 = arith.subf %194, %210 : vector<8x12xf32>
    %cst_137 = arith.constant 9.99999974E-6 : f32
    %212 = vector.broadcast %cst_137 : f32 to vector<8x1xf32>
    %213 = arith.addf %209, %212 : vector<8x1xf32>
    %214 = math.rsqrt %213 : vector<8x1xf32>
    %215 = vector.broadcast %214 : vector<8x1xf32> to vector<8x12xf32>
    %216 = arith.mulf %211, %215 : vector<8x12xf32>
    %217 = vector.broadcast %196 : vector<1x12xf32> to vector<8x12xf32>
    %218 = arith.mulf %216, %217 : vector<8x12xf32>
    %219 = vector.broadcast %198 : vector<1x12xf32> to vector<8x12xf32>
    %220 = arith.addf %218, %219 : vector<8x12xf32>
    %c0_138 = arith.constant 0 : index
    %c0_139 = arith.constant 0 : index
    %c0_140 = arith.constant 0 : index
    %221 = vector.load %arg24[%c0_138, %c0_139, %c0_140] : memref<2x12x32xf32, #tpu.memory_space<vmem>>, vector<1x12x32xf32>
    %222 = vector.shape_cast %221 : vector<1x12x32xf32> to vector<12x32xf32>
    %cst_141 = arith.constant dense<0.000000e+00> : vector<8x32xf32>
    %223 = tpu.matmul %220, %222, %cst_141 {dimension_numbers = #tpu.dot_dimension_numbers<[1], [0], [0], [1], [0, 0, 1, 1], [], []>} : vector<8x12xf32>, vector<12x32xf32>, vector<8x32xf32> -> vector<8x32xf32>
    %c0_142 = arith.constant 0 : index
    %c0_143 = arith.constant 0 : index
    %c0_144 = arith.constant 0 : index
    %224 = vector.load %arg25[%c0_142, %c0_143, %c0_144] : memref<2x1x32xf32, #tpu.memory_space<vmem>>, vector<1x1x32xf32>
    %225 = vector.shape_cast %224 : vector<1x1x32xf32> to vector<1x32xf32>
    %226 = vector.broadcast %225 : vector<1x32xf32> to vector<8x32xf32>
    %227 = arith.addf %223, %226 : vector<8x32xf32>
    %cst_145 = arith.constant 0.000000e+00 : f32
    %228 = vector.broadcast %cst_145 : f32 to vector<8x32xf32>
    %229 = arith.maximumf %227, %228 : vector<8x32xf32>
    %c0_146 = arith.constant 0 : index
    %c0_147 = arith.constant 0 : index
    %c0_148 = arith.constant 0 : index
    %230 = vector.load %arg26[%c0_146, %c0_147, %c0_148] : memref<2x32x12xf32, #tpu.memory_space<vmem>>, vector<1x32x12xf32>
    %231 = vector.shape_cast %230 : vector<1x32x12xf32> to vector<32x12xf32>
    %cst_149 = arith.constant dense<0.000000e+00> : vector<8x12xf32>
    %232 = tpu.matmul %229, %231, %cst_149 {dimension_numbers = #tpu.dot_dimension_numbers<[1], [0], [0], [1], [0, 0, 1, 1], [], []>} : vector<8x32xf32>, vector<32x12xf32>, vector<8x12xf32> -> vector<8x12xf32>
    %c0_150 = arith.constant 0 : index
    %c0_151 = arith.constant 0 : index
    %c0_152 = arith.constant 0 : index
    %233 = vector.load %arg27[%c0_150, %c0_151, %c0_152] : memref<2x1x12xf32, #tpu.memory_space<vmem>>, vector<1x1x12xf32>
    %234 = vector.shape_cast %233 : vector<1x1x12xf32> to vector<1x12xf32>
    %235 = vector.broadcast %234 : vector<1x12xf32> to vector<8x12xf32>
    %236 = arith.addf %232, %235 : vector<8x12xf32>
    %237 = arith.addf %220, %236 : vector<8x12xf32>
    %c0_153 = arith.constant 0 : index
    %c0_154 = arith.constant 0 : index
    %c0_155 = arith.constant 0 : index
    %238 = vector.load %arg28[%c0_153, %c0_154, %c0_155] : memref<2x1x12xf32, #tpu.memory_space<vmem>>, vector<1x1x12xf32>
    %239 = vector.shape_cast %238 : vector<1x1x12xf32> to vector<1x12xf32>
    %c0_156 = arith.constant 0 : index
    %c0_157 = arith.constant 0 : index
    %c0_158 = arith.constant 0 : index
    %240 = vector.load %arg29[%c0_156, %c0_157, %c0_158] : memref<2x1x12xf32, #tpu.memory_space<vmem>>, vector<1x1x12xf32>
    %241 = vector.shape_cast %240 : vector<1x1x12xf32> to vector<1x12xf32>
    %cst_159 = arith.constant dense<0.000000e+00> : vector<8xf32>
    %242 = vector.multi_reduction <add>, %237, %cst_159 [1] : vector<8x12xf32> to vector<8xf32>
    %243 = vector.shape_cast %242 : vector<8xf32> to vector<8x1xf32>
    %cst_160 = arith.constant 1.200000e+01 : f32
    %244 = vector.broadcast %cst_160 : f32 to vector<8x1xf32>
    %245 = arith.divf %243, %244 : vector<8x1xf32>
    %246 = vector.broadcast %245 : vector<8x1xf32> to vector<8x12xf32>
    %247 = arith.subf %237, %246 : vector<8x12xf32>
    %248 = arith.mulf %247, %247 : vector<8x12xf32>
    %cst_161 = arith.constant dense<0.000000e+00> : vector<8xf32>
    %249 = vector.multi_reduction <add>, %248, %cst_161 [1] : vector<8x12xf32> to vector<8xf32>
    %250 = vector.shape_cast %249 : vector<8xf32> to vector<8x1xf32>
    %cst_162 = arith.constant 1.200000e+01 : f32
    %251 = vector.broadcast %cst_162 : f32 to vector<8x1xf32>
    %252 = arith.divf %250, %251 : vector<8x1xf32>
    %253 = vector.broadcast %245 : vector<8x1xf32> to vector<8x12xf32>
    %254 = arith.subf %237, %253 : vector<8x12xf32>
    %cst_163 = arith.constant 9.99999974E-6 : f32
    %255 = vector.broadcast %cst_163 : f32 to vector<8x1xf32>
    %256 = arith.addf %252, %255 : vector<8x1xf32>
    %257 = math.rsqrt %256 : vector<8x1xf32>
    %258 = vector.broadcast %257 : vector<8x1xf32> to vector<8x12xf32>
    %259 = arith.mulf %254, %258 : vector<8x12xf32>
    %260 = vector.broadcast %239 : vector<1x12xf32> to vector<8x12xf32>
    %261 = arith.mulf %259, %260 : vector<8x12xf32>
    %262 = vector.broadcast %241 : vector<1x12xf32> to vector<8x12xf32>
    %263 = arith.addf %261, %262 : vector<8x12xf32>
    %c1_164 = arith.constant 1 : index
    %c0_165 = arith.constant 0 : index
    %c0_166 = arith.constant 0 : index
    %264 = vector.load %arg18[%c1_164, %c0_165, %c0_166] : memref<2x12x12xf32, #tpu.memory_space<vmem>>, vector<1x12x12xf32>
    %265 = vector.shape_cast %264 : vector<1x12x12xf32> to vector<12x12xf32>
    %cst_167 = arith.constant dense<0.000000e+00> : vector<8x12xf32>
    %266 = tpu.matmul %263, %265, %cst_167 {dimension_numbers = #tpu.dot_dimension_numbers<[1], [0], [0], [1], [0, 0, 1, 1], [], []>} : vector<8x12xf32>, vector<12x12xf32>, vector<8x12xf32> -> vector<8x12xf32>
    %c1_168 = arith.constant 1 : index
    %c0_169 = arith.constant 0 : index
    %c0_170 = arith.constant 0 : index
    %267 = vector.load %arg19[%c1_168, %c0_169, %c0_170] : memref<2x1x12xf32, #tpu.memory_space<vmem>>, vector<1x1x12xf32>
    %268 = vector.shape_cast %267 : vector<1x1x12xf32> to vector<1x12xf32>
    %269 = vector.broadcast %268 : vector<1x12xf32> to vector<8x12xf32>
    %270 = arith.addf %266, %269 : vector<8x12xf32>
    %c1_171 = arith.constant 1 : index
    %c0_172 = arith.constant 0 : index
    %c0_173 = arith.constant 0 : index
    %271 = vector.load %arg20[%c1_171, %c0_172, %c0_173] : memref<2x12x12xf32, #tpu.memory_space<vmem>>, vector<1x12x12xf32>
    %272 = vector.shape_cast %271 : vector<1x12x12xf32> to vector<12x12xf32>
    %cst_174 = arith.constant dense<0.000000e+00> : vector<8x12xf32>
    %273 = tpu.matmul %270, %272, %cst_174 {dimension_numbers = #tpu.dot_dimension_numbers<[1], [0], [0], [1], [0, 0, 1, 1], [], []>} : vector<8x12xf32>, vector<12x12xf32>, vector<8x12xf32> -> vector<8x12xf32>
    %c1_175 = arith.constant 1 : index
    %c0_176 = arith.constant 0 : index
    %c0_177 = arith.constant 0 : index
    %274 = vector.load %arg21[%c1_175, %c0_176, %c0_177] : memref<2x1x12xf32, #tpu.memory_space<vmem>>, vector<1x1x12xf32>
    %275 = vector.shape_cast %274 : vector<1x1x12xf32> to vector<1x12xf32>
    %276 = vector.broadcast %275 : vector<1x12xf32> to vector<8x12xf32>
    %277 = arith.addf %273, %276 : vector<8x12xf32>
    %278 = arith.addf %263, %277 : vector<8x12xf32>
    %c1_178 = arith.constant 1 : index
    %c0_179 = arith.constant 0 : index
    %c0_180 = arith.constant 0 : index
    %279 = vector.load %arg22[%c1_178, %c0_179, %c0_180] : memref<2x1x12xf32, #tpu.memory_space<vmem>>, vector<1x1x12xf32>
    %280 = vector.shape_cast %279 : vector<1x1x12xf32> to vector<1x12xf32>
    %c1_181 = arith.constant 1 : index
    %c0_182 = arith.constant 0 : index
    %c0_183 = arith.constant 0 : index
    %281 = vector.load %arg23[%c1_181, %c0_182, %c0_183] : memref<2x1x12xf32, #tpu.memory_space<vmem>>, vector<1x1x12xf32>
    %282 = vector.shape_cast %281 : vector<1x1x12xf32> to vector<1x12xf32>
    %cst_184 = arith.constant dense<0.000000e+00> : vector<8xf32>
    %283 = vector.multi_reduction <add>, %278, %cst_184 [1] : vector<8x12xf32> to vector<8xf32>
    %284 = vector.shape_cast %283 : vector<8xf32> to vector<8x1xf32>
    %cst_185 = arith.constant 1.200000e+01 : f32
    %285 = vector.broadcast %cst_185 : f32 to vector<8x1xf32>
    %286 = arith.divf %284, %285 : vector<8x1xf32>
    %287 = vector.broadcast %286 : vector<8x1xf32> to vector<8x12xf32>
    %288 = arith.subf %278, %287 : vector<8x12xf32>
    %289 = arith.mulf %288, %288 : vector<8x12xf32>
    %cst_186 = arith.constant dense<0.000000e+00> : vector<8xf32>
    %290 = vector.multi_reduction <add>, %289, %cst_186 [1] : vector<8x12xf32> to vector<8xf32>
    %291 = vector.shape_cast %290 : vector<8xf32> to vector<8x1xf32>
    %cst_187 = arith.constant 1.200000e+01 : f32
    %292 = vector.broadcast %cst_187 : f32 to vector<8x1xf32>
    %293 = arith.divf %291, %292 : vector<8x1xf32>
    %294 = vector.broadcast %286 : vector<8x1xf32> to vector<8x12xf32>
    %295 = arith.subf %278, %294 : vector<8x12xf32>
    %cst_188 = arith.constant 9.99999974E-6 : f32
    %296 = vector.broadcast %cst_188 : f32 to vector<8x1xf32>
    %297 = arith.addf %293, %296 : vector<8x1xf32>
    %298 = math.rsqrt %297 : vector<8x1xf32>
    %299 = vector.broadcast %298 : vector<8x1xf32> to vector<8x12xf32>
    %300 = arith.mulf %295, %299 : vector<8x12xf32>
    %301 = vector.broadcast %280 : vector<1x12xf32> to vector<8x12xf32>
    %302 = arith.mulf %300, %301 : vector<8x12xf32>
    %303 = vector.broadcast %282 : vector<1x12xf32> to vector<8x12xf32>
    %304 = arith.addf %302, %303 : vector<8x12xf32>
    %c1_189 = arith.constant 1 : index
    %c0_190 = arith.constant 0 : index
    %c0_191 = arith.constant 0 : index
    %305 = vector.load %arg24[%c1_189, %c0_190, %c0_191] : memref<2x12x32xf32, #tpu.memory_space<vmem>>, vector<1x12x32xf32>
    %306 = vector.shape_cast %305 : vector<1x12x32xf32> to vector<12x32xf32>
    %cst_192 = arith.constant dense<0.000000e+00> : vector<8x32xf32>
    %307 = tpu.matmul %304, %306, %cst_192 {dimension_numbers = #tpu.dot_dimension_numbers<[1], [0], [0], [1], [0, 0, 1, 1], [], []>} : vector<8x12xf32>, vector<12x32xf32>, vector<8x32xf32> -> vector<8x32xf32>
    %c1_193 = arith.constant 1 : index
    %c0_194 = arith.constant 0 : index
    %c0_195 = arith.constant 0 : index
    %308 = vector.load %arg25[%c1_193, %c0_194, %c0_195] : memref<2x1x32xf32, #tpu.memory_space<vmem>>, vector<1x1x32xf32>
    %309 = vector.shape_cast %308 : vector<1x1x32xf32> to vector<1x32xf32>
    %310 = vector.broadcast %309 : vector<1x32xf32> to vector<8x32xf32>
    %311 = arith.addf %307, %310 : vector<8x32xf32>
    %cst_196 = arith.constant 0.000000e+00 : f32
    %312 = vector.broadcast %cst_196 : f32 to vector<8x32xf32>
    %313 = arith.maximumf %311, %312 : vector<8x32xf32>
    %c1_197 = arith.constant 1 : index
    %c0_198 = arith.constant 0 : index
    %c0_199 = arith.constant 0 : index
    %314 = vector.load %arg26[%c1_197, %c0_198, %c0_199] : memref<2x32x12xf32, #tpu.memory_space<vmem>>, vector<1x32x12xf32>
    %315 = vector.shape_cast %314 : vector<1x32x12xf32> to vector<32x12xf32>
    %cst_200 = arith.constant dense<0.000000e+00> : vector<8x12xf32>
    %316 = tpu.matmul %313, %315, %cst_200 {dimension_numbers = #tpu.dot_dimension_numbers<[1], [0], [0], [1], [0, 0, 1, 1], [], []>} : vector<8x32xf32>, vector<32x12xf32>, vector<8x12xf32> -> vector<8x12xf32>
    %c1_201 = arith.constant 1 : index
    %c0_202 = arith.constant 0 : index
    %c0_203 = arith.constant 0 : index
    %317 = vector.load %arg27[%c1_201, %c0_202, %c0_203] : memref<2x1x12xf32, #tpu.memory_space<vmem>>, vector<1x1x12xf32>
    %318 = vector.shape_cast %317 : vector<1x1x12xf32> to vector<1x12xf32>
    %319 = vector.broadcast %318 : vector<1x12xf32> to vector<8x12xf32>
    %320 = arith.addf %316, %319 : vector<8x12xf32>
    %321 = arith.addf %304, %320 : vector<8x12xf32>
    %c1_204 = arith.constant 1 : index
    %c0_205 = arith.constant 0 : index
    %c0_206 = arith.constant 0 : index
    %322 = vector.load %arg28[%c1_204, %c0_205, %c0_206] : memref<2x1x12xf32, #tpu.memory_space<vmem>>, vector<1x1x12xf32>
    %323 = vector.shape_cast %322 : vector<1x1x12xf32> to vector<1x12xf32>
    %c1_207 = arith.constant 1 : index
    %c0_208 = arith.constant 0 : index
    %c0_209 = arith.constant 0 : index
    %324 = vector.load %arg29[%c1_207, %c0_208, %c0_209] : memref<2x1x12xf32, #tpu.memory_space<vmem>>, vector<1x1x12xf32>
    %325 = vector.shape_cast %324 : vector<1x1x12xf32> to vector<1x12xf32>
    %cst_210 = arith.constant dense<0.000000e+00> : vector<8xf32>
    %326 = vector.multi_reduction <add>, %321, %cst_210 [1] : vector<8x12xf32> to vector<8xf32>
    %327 = vector.shape_cast %326 : vector<8xf32> to vector<8x1xf32>
    %cst_211 = arith.constant 1.200000e+01 : f32
    %328 = vector.broadcast %cst_211 : f32 to vector<8x1xf32>
    %329 = arith.divf %327, %328 : vector<8x1xf32>
    %330 = vector.broadcast %329 : vector<8x1xf32> to vector<8x12xf32>
    %331 = arith.subf %321, %330 : vector<8x12xf32>
    %332 = arith.mulf %331, %331 : vector<8x12xf32>
    %cst_212 = arith.constant dense<0.000000e+00> : vector<8xf32>
    %333 = vector.multi_reduction <add>, %332, %cst_212 [1] : vector<8x12xf32> to vector<8xf32>
    %334 = vector.shape_cast %333 : vector<8xf32> to vector<8x1xf32>
    %cst_213 = arith.constant 1.200000e+01 : f32
    %335 = vector.broadcast %cst_213 : f32 to vector<8x1xf32>
    %336 = arith.divf %334, %335 : vector<8x1xf32>
    %337 = vector.broadcast %329 : vector<8x1xf32> to vector<8x12xf32>
    %338 = arith.subf %321, %337 : vector<8x12xf32>
    %cst_214 = arith.constant 9.99999974E-6 : f32
    %339 = vector.broadcast %cst_214 : f32 to vector<8x1xf32>
    %340 = arith.addf %336, %339 : vector<8x1xf32>
    %341 = math.rsqrt %340 : vector<8x1xf32>
    %342 = vector.broadcast %341 : vector<8x1xf32> to vector<8x12xf32>
    %343 = arith.mulf %338, %342 : vector<8x12xf32>
    %344 = vector.broadcast %323 : vector<1x12xf32> to vector<8x12xf32>
    %345 = arith.mulf %343, %344 : vector<8x12xf32>
    %346 = vector.broadcast %325 : vector<1x12xf32> to vector<8x12xf32>
    %347 = arith.addf %345, %346 : vector<8x12xf32>
    %c0_215 = arith.constant 0 : index
    %c0_216 = arith.constant 0 : index
    %348 = vector.load %arg30[%c0_215, %c0_216] : memref<1x16xf32, #tpu.memory_space<vmem>>, vector<1x16xf32>
    %349 = vector.broadcast %348 : vector<1x16xf32> to vector<8x16xf32>
    %350 = arith.mulf %179, %349 : vector<8x16xf32>
    %cst_217 = arith.constant dense<0.000000e+00> : vector<8xf32>
    %351 = vector.multi_reduction <add>, %350, %cst_217 [1] : vector<8x16xf32> to vector<8xf32>
    %352 = vector.shape_cast %351 : vector<8xf32> to vector<8x1xf32>
    %c0_218 = arith.constant 0 : index
    %c0_219 = arith.constant 0 : index
    %353 = vector.load %arg31[%c0_218, %c0_219] : memref<1x1xf32, #tpu.memory_space<vmem>>, vector<1x1xf32>
    %354 = vector.broadcast %353 : vector<1x1xf32> to vector<8x1xf32>
    %355 = arith.addf %352, %354 : vector<8x1xf32>
    %356 = arith.negf %355 : vector<8x1xf32>
    %357 = math.exp %356 : vector<8x1xf32>
    %cst_220 = arith.constant 1.000000e+00 : f32
    %358 = vector.broadcast %cst_220 : f32 to vector<8x1xf32>
    %359 = arith.addf %358, %357 : vector<8x1xf32>
    %360 = arith.divf %358, %359 : vector<8x1xf32>
    %c0_221 = arith.constant 0 : index
    %c0_222 = arith.constant 0 : index
    %361 = vector.load %arg32[%c0_221, %c0_222] : memref<1x12xf32, #tpu.memory_space<vmem>>, vector<1x12xf32>
    %362 = vector.broadcast %361 : vector<1x12xf32> to vector<8x12xf32>
    %363 = arith.mulf %347, %362 : vector<8x12xf32>
    %cst_223 = arith.constant dense<0.000000e+00> : vector<8xf32>
    %364 = vector.multi_reduction <add>, %363, %cst_223 [1] : vector<8x12xf32> to vector<8xf32>
    %365 = vector.shape_cast %364 : vector<8xf32> to vector<8x1xf32>
    %c0_224 = arith.constant 0 : index
    %c0_225 = arith.constant 0 : index
    %366 = vector.load %arg33[%c0_224, %c0_225] : memref<1x1xf32, #tpu.memory_space<vmem>>, vector<1x1xf32>
    %367 = vector.broadcast %366 : vector<1x1xf32> to vector<8x1xf32>
    %368 = arith.addf %365, %367 : vector<8x1xf32>
    %369 = arith.negf %368 : vector<8x1xf32>
    %370 = math.exp %369 : vector<8x1xf32>
    %cst_226 = arith.constant 1.000000e+00 : f32
    %371 = vector.broadcast %cst_226 : f32 to vector<8x1xf32>
    %372 = arith.addf %371, %370 : vector<8x1xf32>
    %373 = arith.divf %371, %372 : vector<8x1xf32>
    %374 = vector.broadcast %360 : vector<8x1xf32> to vector<8x16xf32>
    %375 = arith.mulf %179, %374 : vector<8x16xf32>
    %376 = vector.broadcast %373 : vector<8x1xf32> to vector<8x12xf32>
    %377 = arith.mulf %347, %376 : vector<8x12xf32>
    %c0_227 = arith.constant 0 : index
    %c0_228 = arith.constant 0 : index
    %378 = vector.load %arg34[%c0_227, %c0_228] : memref<16x32xf32, #tpu.memory_space<vmem>>, vector<16x32xf32>
    %cst_229 = arith.constant dense<0.000000e+00> : vector<8x32xf32>
    %379 = tpu.matmul %375, %378, %cst_229 {dimension_numbers = #tpu.dot_dimension_numbers<[1], [0], [0], [1], [0, 0, 1, 1], [], []>} : vector<8x16xf32>, vector<16x32xf32>, vector<8x32xf32> -> vector<8x32xf32>
    %c0_230 = arith.constant 0 : index
    %c0_231 = arith.constant 0 : index
    %380 = vector.load %arg35[%c0_230, %c0_231] : memref<12x32xf32, #tpu.memory_space<vmem>>, vector<12x32xf32>
    %cst_232 = arith.constant dense<0.000000e+00> : vector<8x32xf32>
    %381 = tpu.matmul %377, %380, %cst_232 {dimension_numbers = #tpu.dot_dimension_numbers<[1], [0], [0], [1], [0, 0, 1, 1], [], []>} : vector<8x12xf32>, vector<12x32xf32>, vector<8x32xf32> -> vector<8x32xf32>
    %382 = arith.addf %379, %381 : vector<8x32xf32>
    %c0_233 = arith.constant 0 : index
    %c0_234 = arith.constant 0 : index
    %383 = vector.load %arg36[%c0_233, %c0_234] : memref<1x32xf32, #tpu.memory_space<vmem>>, vector<1x32xf32>
    %384 = vector.broadcast %383 : vector<1x32xf32> to vector<8x32xf32>
    %385 = arith.addf %382, %384 : vector<8x32xf32>
    %cst_235 = arith.constant 0.000000e+00 : f32
    %386 = vector.broadcast %cst_235 : f32 to vector<8x32xf32>
    %387 = arith.maximumf %385, %386 : vector<8x32xf32>
    %c0_236 = arith.constant 0 : index
    %c0_237 = arith.constant 0 : index
    %388 = vector.load %arg37[%c0_236, %c0_237] : memref<32x128xf32, #tpu.memory_space<vmem>>, vector<32x128xf32>
    %cst_238 = arith.constant dense<0.000000e+00> : vector<8x128xf32>
    %389 = tpu.matmul %387, %388, %cst_238 {dimension_numbers = #tpu.dot_dimension_numbers<[1], [0], [0], [1], [0, 0, 1, 1], [], []>} : vector<8x32xf32>, vector<32x128xf32>, vector<8x128xf32> -> vector<8x128xf32>
    %c0_239 = arith.constant 0 : index
    %c0_240 = arith.constant 0 : index
    %390 = vector.load %arg38[%c0_239, %c0_240] : memref<1x128xf32, #tpu.memory_space<vmem>>, vector<1x128xf32>
    %391 = vector.broadcast %390 : vector<1x128xf32> to vector<8x128xf32>
    %392 = arith.addf %389, %391 : vector<8x128xf32>
    %c0_241 = arith.constant 0 : index
    %c0_242 = arith.constant 0 : index
    %393 = vector.load %arg39[%c0_241, %c0_242] : memref<8x128xf32, #tpu.memory_space<vmem>>, vector<8x128xf32>
    tpu.vector_store %arg39[%c0_241, %c0_242], %392 {strides = array<i32>} : memref<8x128xf32, #tpu.memory_space<vmem>>, vector<8x128xf32>,
    return
  }
}

</mosaic_0001>

<bundles_post_ra>
// kernel: tpu_custom_call.1
= control target key start
LH: loop header
LB: loop body
LE: loop exit
PB: predicated region body
PF: predicated region fallthrough
CT: control target
= control target key end

     0   :  { %s2838_s6 = smov 1   ;;  %s2839_s10 = smov 2   ;;  %s3321_s0 = inlined_call_operand.smem [shape: u32[40], index: -1, kind: input, shape index: {}] }
   0x1   :  { %s2891_s5 = sld [smem:[%s3321_s0]]   ;;  %s2840_s14 = smov 3  }
   0x2   :  { %s2896_s9 = sld [smem:[%s3321_s0 + %s2838_s6]]   ;;  %s2841_s18 = smov 4  }
   0x3   :  { %s2901_s13 = sld [smem:[%s3321_s0 + %s2839_s10]]   ;;  %s2842_s22 = smov 5  }
   0x4   :  { %s2906_s17 = sld [smem:[%s3321_s0 + %s2840_s14]]   ;;  %s2843_s26 = smov 6  }
   0x5   :  { %s2911_s21 = sld [smem:[%s3321_s0 + %s2841_s18]]   ;;  %s2844_s30 = smov 7  }
   0x6   :  { %s2916_s25 = sld [smem:[%s3321_s0 + %s2842_s22]]   ;;  %s2845_s4 = smov 8  }
   0x7   :  { %s2921_s29 = sld [smem:[%s3321_s0 + %s2843_s26]]   ;;  %s2846_s10 = smov 9  }
   0x8   :  { %s2926_s3 = sld [smem:[%s3321_s0 + %s2844_s30]]   ;;  %s2847_s15 = smov 10  }
   0x9   :  { %s2931_s8 = sld [smem:[%s3321_s0 + %s2845_s4]]   ;;  %s2848_s20 = smov 11  }
   0xa   :  { %s2936_s14 = sld [smem:[%s3321_s0 + %s2846_s10]]   ;;  %s2849_s26 = smov 12  }
   0xb   :  { %s2941_s19 = sld [smem:[%s3321_s0 + %s2847_s15]]   ;;  %s2850_s1 = smov 13  }
   0xc   :  { %3339 = sst [smem:[#allocation7_spill]] %s2916_s25  ;;  %s2851_s7 = smov 14  }
   0xd   :  { %s2946_s24 = sld [smem:[%s3321_s0 + %s2848_s20]]   ;;  %s2852_s15 = smov 15  }
   0xe   :  { %s2951_s30 = sld [smem:[%s3321_s0 + %s2849_s26]]   ;;  %s2853_s22 = smov 16  }
   0xf   :  { %s2956_s6 = sld [smem:[%s3321_s0 + %s2850_s1]]   ;;  %s2854_s28 = smov 17  }
  0x10   :  { %s2961_s12 = sld [smem:[%s3321_s0 + %s2851_s7]]   ;;  %s2855_s7 = smov 18  }
  0x11   :  { %s2966_s20 = sld [smem:[%s3321_s0 + %s2852_s15]]   ;;  %s2856_s15 = smov 19  }
  0x12   :  { %s2971_s27 = sld [smem:[%s3321_s0 + %s2853_s22]]   ;;  %s2857_s22 = smov 20  }
  0x13   :  { %s2976_s4 = sld [smem:[%s3321_s0 + %s2854_s28]]   ;;  %s2858_s28 = smov 21  }
  0x14   :  { %s2981_s25 = sld [smem:[%s3321_s0 + %s2855_s7]]   ;;  %s2859_s7 = smov 22  }
  0x15   :  { %3340 = sst [smem:[#allocation8_spill]] %s2956_s6  ;;  %s2869_s23 = smov 32  }
  0x16   :  { %s2870_s1 = smov 34   ;;  %s2871_s10 = smov 35  }
  0x17   :  { %3341 = sst [smem:[#allocation9_spill]] %s2966_s20  ;;  %s2872_s16 = smov 36  }
  0x18   :  { %3342 = sst [smem:[#allocation10_spill]] %s2971_s27 }
  0x19   :  { %3343 = sst [smem:[#allocation11_spill]] %s2976_s4 }
  0x1a   :  { %3344 = sst [smem:[#allocation12_spill]] %s2981_s25 }
  0x1b   :  { %s2986_s20 = sld [smem:[%s3321_s0 + %s2856_s15]]   ;;  %s2860_s15 = smov 23  }
  0x1c   :  { %s2991_s27 = sld [smem:[%s3321_s0 + %s2857_s22]]   ;;  %s2861_s22 = smov 24  }
  0x1d   :  { %s2996_s4 = sld [smem:[%s3321_s0 + %s2858_s28]]   ;;  %s2862_s28 = smov 25  }
  0x1e   :  { %s3001_s25 = sld [smem:[%s3321_s0 + %s2859_s7]]   ;;  %s2863_s7 = smov 26  }
  0x1f   :  { %s3064_s6 = sld [smem:[%s3321_s0 + %s2872_s16]]   ;;  %s2876_s16 = smov 33  }
  0x21   :  { %3345 = sst [smem:[#allocation13_spill]] %s2986_s20 }
  0x22   :  { %3346 = sst [smem:[#allocation14_spill]] %s2991_s27 }
  0x23   :  { %3347 = sst [smem:[#allocation15_spill]] %s2996_s4 }
  0x24   :  { %3348 = sst [smem:[#allocation16_spill]] %s3001_s25 }
  0x25   :  { %s3006_s20 = sld [smem:[%s3321_s0 + %s2860_s15]]   ;;  %s2864_s15 = smov 27  }
  0x26   :  { %s3011_s27 = sld [smem:[%s3321_s0 + %s2861_s22]]   ;;  %s2865_s22 = smov 28  }
  0x27   :  { %s3016_s4 = sld [smem:[%s3321_s0 + %s2862_s28]]   ;;  %s2866_s28 = smov 29  }
  0x28   :  { %s3021_s25 = sld [smem:[%s3321_s0 + %s2863_s7]]   ;;  %s2867_s7 = smov 30  }
  0x29   :  { %3359 = sst [smem:[#allocation27_spill]] %s3064_s6 }
  0x2b   :  { %3349 = sst [smem:[#allocation17_spill]] %s3006_s20 }
  0x2c   :  { %3350 = sst [smem:[#allocation18_spill]] %s3011_s27 }
  0x2d   :  { %3351 = sst [smem:[#allocation19_spill]] %s3016_s4 }
  0x2e   :  { %3352 = sst [smem:[#allocation20_spill]] %s3021_s25 }
  0x2f   :  { %s3026_s20 = sld [smem:[%s3321_s0 + %s2864_s15]]   ;;  %s2868_s15 = smov 31  }
  0x30   :  { %s3031_s27 = sld [smem:[%s3321_s0 + %s2865_s22]]  }
  0x31   :  { %s3036_s4 = sld [smem:[%s3321_s0 + %s2866_s28]]  }
  0x32   :  { %s3041_s25 = sld [smem:[%s3321_s0 + %s2867_s7]]  }
  0x35   :  { %3353 = sst [smem:[#allocation21_spill]] %s3026_s20 }
  0x36   :  { %3354 = sst [smem:[#allocation22_spill]] %s3031_s27 }
  0x37   :  { %3355 = sst [smem:[#allocation23_spill]] %s3036_s4 }
  0x38   :  { %3356 = sst [smem:[#allocation24_spill]] %s3041_s25 }
  0x39   :  { %s2301_s20 = sld [smem:[%s3321_s0 + %s2868_s15]]  }
  0x3a   :  { %s3049_s27 = sld [smem:[%s3321_s0 + %s2869_s23]]   ;;  %s2873_s23 = smov 37  }
  0x3b   :  { %s3054_s4 = sld [smem:[%s3321_s0 + %s2870_s1]]   ;;  %s2874_s1 = smov 38  }
  0x3c   :  { %s3059_s25 = sld [smem:[%s3321_s0 + %s2871_s10]]   ;;  %s2875_s10 = smov 39  }
  0x3d   :  { %s3079_s15 = sld [smem:[%s3321_s0 + %s2875_s10]]  }
  0x3f   :  { %v84_v0 = vstv %s2301_s20 }
  0x40   :  { %3357 = sst [smem:[#allocation25_spill]] %s3049_s27  ;;  %85 = vst [vmem:[#allocation2] sm:$0x1] %v84_v0 }
  0x41   :  { %3358 = sst [smem:[#allocation26_spill]] %s3054_s4 }
  0x42   :  { %s3069_s27 = sld [smem:[%s3321_s0 + %s2873_s23]]  }
  0x43   :  { %s3074_s4 = sld [smem:[%s3321_s0 + %s2874_s1]]  }
  0x44   :  { %s2303_s23 = sld [smem:[%s3321_s0 + %s2876_s16]]  }
  0x4a   :  { %v86_v1 = vstv %s2303_s23 }
  0x4b   :  { %87 = vst [vmem:[#allocation3] sm:$0x1] %v86_v1 }
  0x4c   :  { %v168_v2 = vld [vmem:[%s2901_s13] sm:$0xff]  ;;  %v169_v3 = vld [vmem:[%s2901_s13 + $0x8] sm:$0xff]  ;;  %v2877_v4 = vmov 0.0|0.0   ;;  %vm2878_vm0 = vmmov 0   ;;  %v2879_v6 = vmov 0.0  }
  0x4d   :  { %2657 = vmatprep.subr.bf16.mxu1 %v2877_v4  ;;  %v2658_v5 = vpack.c.bf16 %v169_v3, %v168_v2  ;;  %2494 = vmatprep.mubr.msk.f32.mxu1 %vm2878_vm0, %v2879_v6 }
  0x4e   :  { %88 = vsyncpa [#allocation5], 0  ;;  %2664 = vmatprep.subr.bf16.mxu0 %v2877_v4  ;;  %2508 = vmatprep.mubr.msk.f32.mxu0 %vm2878_vm0, %v2879_v6  ;;  %v167_v7 = vld [vmem:[%s2891_s5] sm:$0xff]  ;;  %vm177_vm1 = vcmask 130048   ;;  %v340_v9 = vld [vmem:[%s2921_s29 + $0x8] sm:$0xff]  ;;  %vm265_vm2 = vcmask 1043456  }
  0x4f   :  { %2659 = vmatpush3.bf16.msra.mxu1 %v2658_v5  ;;  %v339_v8 = vld [vmem:[%s2921_s29] sm:$0xff]  ;;  %v253_v12 = vld [vmem:[%s2911_s21 + $0x8] sm:$0xf]  ;;  %vm2880_vm3 = vmmov 1   ;;  %vm261_vm5 = vcmask 97280   ;;  %s3362_s0 = sld [smem:[#allocation8_spill]] }
  0x50   :  { %2660 = vmatprep.subr.bf16.mxu1 %v2877_v4  ;;  %v2665_v10 = vpack.c.bf16 %v340_v9, %v339_v8  ;;  %v252_v11 = vld [vmem:[%s2911_s21] sm:$0xff]  ;;  %vm3102_vm4 = vmpackc.low %vm265_vm2, %vm2880_vm3  ;;  %v422_v16 = vld [vmem:[%s2931_s8 + $0x8] sm:$0xff]  ;;  %s3363_s5 = sld [smem:[#allocation9_spill]]  ;;  %vm628_vm6 = vcmask 261120   ;;  %s3365_s13 = sld [smem:[#allocation11_spill]] }
  0x51   :  { %v2661_v13 = vpack.c.bf16 %v253_v12, %v252_v11  ;;  %v421_v15 = vld [vmem:[%s2931_s8] sm:$0xff]  ;;  %v535_v41 = vld [vmem:[%s2951_s30 + $0x8] sm:$0xff]  ;;  %v619_v55 = vld [vmem:[%s2961_s12 + $0x10] sm:$0xff]  ;;  %s3367_s21 = sld [smem:[#allocation7_spill]]  ;;  %s3375_s6 = sld [smem:[#allocation19_spill]] }
  0x52   :  { %2495 = vmatmul.mubr.msk.f32.vlgmr.msra.gmra.mrb[0].mxu1 %vm177_vm1, %v167_v7  ;;  %2666 = vmatpush3.bf16.msra.mxu0 %v2665_v10  ;;  %v251_v17 = vld [vmem:[%s2896_s9] sm:$0xff]  ;;  %v2668_v18 = vpack.c.bf16 %v422_v16, %v421_v15  ;;  %v618_v44 = vld [vmem:[%s2961_s12 + $0x8] sm:$0xff]  ;;  %v620_v56 = vld [vmem:[%s2961_s12 + $0x18] sm:$0xff]  ;;  %s3364_s9 = sld [smem:[#allocation10_spill]]  ;;  %s3377_s20 = sld [smem:[#allocation22_spill]] }
  0x53   :  { %2501 = vmatprep.mubr.msk.f32.mxu1 %vm2878_vm0, %v2879_v6  ;;  %2670 = vmatprep.subr.bf16.mxu0 %v2877_v4  ;;  %v2310_v19 = vld [vmem:[%s2906_s17] ss:$0 sm:$0xff]  ;;  %v2677_v57 = vpack.c.bf16 %v620_v56, %v619_v55  ;;  %v2327_v12 = vld [vmem:[%s2921_s29 + $0x10] sm:$0xff]  ;;  %s3366_s17 = sld [smem:[#allocation12_spill]]  ;;  %s3378_s22 = sld [smem:[#allocation23_spill]] }
  0x54   :  { %2663 = vmatpush3.bf16.msk.msra.mxu1 %vm3102_vm4, %v2661_v13  ;;  %v2315_v25 = vld [vmem:[%s2926_s3] ss:$0 sm:$0xff]  ;;  %v2328_v13 = vld [vmem:[%s2921_s29 + $0x18] sm:$0xff]  ;;  %s3368_s29 = sld [smem:[#allocation14_spill]]  ;;  %s3379_s26 = sld [smem:[#allocation24_spill]] }
  0x55   :  { %2667 = vmatprep.subr.bf16.mxu1 %v2877_v4  ;;  %v2317_v29 = vld [vmem:[%s2936_s14] ss:$0 sm:$0xff]  ;;  %v2680_v15 = vpack.c.bf16 %v2328_v13, %v2327_v12  ;;  %s3380_s1 = sld [smem:[#allocation25_spill]]  ;;  %s3381_s28 = sld [smem:[#allocation26_spill]] }
  0x56   :  { %v534_v40 = vld [vmem:[%s2951_s30] sm:$0xff]  ;;  %s2882_s2 = smov [#allocation4]  }
  0x57   :  { %2502 = vmatmul.mubr.msk.f32.vlgmr.msra.gmra.mrb[2].mxu1 %vm261_vm5, %v251_v17  ;;  %v2671_v42 = vpack.c.bf16 %v535_v41, %v534_v40  ;;  %v617_v43 = vld [vmem:[%s2961_s12] sm:$0xff]  ;;  %s2263_s10 = sshll.u32 %s2882_s2, 4  ;;  %s2264_s10 = int_to_ptr.vmem [resolvable:$true] %s2263_s10 }
  0x58   :  { %2669 = vmatpush3.bf16.msra.mxu1 %v2668_v18  ;;  %2515 = vmatprep.mubr.msk.f32.mxu1 %vm2878_vm0, %v2879_v6  ;;  %v2674_v45 = vpack.c.bf16 %v618_v44, %v617_v43  ;;  %v2319_v50 = vld [vmem:[%s2941_s19] ss:$0 sm:$0xff]  ;;  %v2341_v44 = vld [vmem:[%s2951_s30 + $0x10] sm:$0xff]  ;;  %p2819_p1 = scmp.lt.s32.totalorder %s2264_s10, %s2264_s10 }
  0x59   :  { %2673 = vmatprep.subr.bf16.mxu1 %v2877_v4  ;;  %v2320_v52 = vld [vmem:[%s2946_s24] ss:$0 sm:$0xff] }
  0x5a   :  { %v2321_v58 = vld [vmem:[%s3362_s0] ss:$0 sm:$0xff] }
  0x5b   :  { %v2323_v63 = vld [vmem:[%s3363_s5] ss:$0 sm:$0xff] }
  0x5c   :  { %v1135_v56 = vld [vmem:[%s3366_s17] sm:$0xff] }
 0x125   :  { %v247_v20 = vpop.f32.mrb[0].mxu1 }
 0x126   :  { %v248_v21 = vadd.f32 %v2310_v19, %v247_v20  ;;  %v2496_v22 = vpop.f32.mrb[1].mxu1  ;;  %v2325_v20 = vld [vmem:[%s3364_s9] ss:$0 sm:$0xff] }
 0x127   :  { %v2332_v22 = vld [vmem:[%s2931_s8 + $0x10] sm:$0xff] }
 0x128   :  { %2509 = vmatmul.mubr.msk.f32.vlgmr.msra.gmra.mrb[0].mxu0 %vm177_vm1, %v248_v21 }
 0x129   :  { %2522 = vmatprep.mubr.msk.f32.mxu0 %vm2878_vm0, %v2879_v6  ;;  %2672 = vmatpush3.bf16.msra.mxu0 %v2671_v42 }
 0x12a   :  { %v3120_v23 = vpop.f32.mrb[2].mxu1  ;;  %2679 = vmatprep.subr.bf16.mxu0 %v2877_v4 }
 0x12b   :  { %v2503_v24 = vpop.f32.mrb[3].mxu1 }
 0x12c   :  { %v2333_v24 = vld [vmem:[%s2931_s8 + $0x18] sm:$0xff]  ;;  %s3370_s8 = sld [smem:[#allocation15_spill]] }
 0x1fb   :  { %v417_v26 = vpop.f32.mrb[0].mxu0 }
 0x1fc   :  { %v418_v27 = vadd.f32 %v2315_v25, %v417_v26  ;;  %v2510_v28 = vpop.f32.mrb[1].mxu0  ;;  %v2326_v25 = vld [vmem:[%s3365_s13] ss:$0 sm:$0xff] }
 0x1fe   :  { %2516 = vmatmul.mubr.msk.f32.vlgmr.msra.gmra.mrb[4].mxu1 %vm177_vm1, %v418_v27  ;;  %v2683_v27 = vpack.c.bf16 %v2333_v24, %v2332_v22 }
 0x1ff   :  { %2533 = vmatprep.mubr.msk.f32.mxu1 %vm2878_vm0, %v2879_v6  ;;  %2675 = vmatpush3.bf16.msra.mxu1 %v2674_v45  ;;  %v2342_v45 = vld [vmem:[%s2951_s30 + $0x18] sm:$0xff]  ;;  %s3374_s30 = sld [smem:[#allocation17_spill]] }
 0x200   :  { %2676 = vmatprep.subr.bf16.mxu1 %v2877_v4 }
 0x203   :  { %2678 = vmatpush3.bf16.msra.mxu1 %v2677_v57  ;;  %v1136_v57 = vld [vmem:[%s3366_s17 + $0x8] sm:$0xf] }
 0x204   :  { %2685 = vmatprep.subr.bf16.mxu1 %v2877_v4 }
 0x2d1   :  { %v499_v30 = vpop.f32.mrb[4].mxu1 }
 0x2d2   :  { %v500_v31 = vadd.f32 %v2317_v29, %v499_v30  ;;  %v2517_v32 = vpop.f32.mrb[5].mxu1  ;;  %v2330_v29 = vld [vmem:[%s2926_s3 + $0x1] ss:$0 sm:$0xff]  ;;  %s3369_s3 = sld [smem:[#allocation13_spill]] }
 0x2d4   :  { %v503_v33 = vadd.f32 %v500_v31, %v248_v21 }
 0x2d6   :  { %v506_v34 = vsel %vm177_vm1, %v503_v33, 0.0 }
 0x2d7   :  { %507 = vadd.xlane.f32.xlu0 %v506_v34 }
 0x364   :  { %v508_v35 = vpop.xlane.xlu0 %507 }
 0x365   :  { %v510_v36 = vmul.f32 0.0625, %v508_v35 }
 0x367   :  { %v511_v37 = vsub.f32 %v503_v33, %v510_v36  ;;  %v2335_v33 = vld [vmem:[%s2936_s14 + $0x1] ss:$0 sm:$0xff]  ;;  %s3371_s14 = sld [smem:[#allocation18_spill]] }
 0x369   :  { %v512_v38 = vmul.f32 %v511_v37, %v511_v37 }
 0x36b   :  { %v513_v39 = vsel %vm177_vm1, %v512_v38, 0.0 }
 0x36c   :  { %514 = vadd.xlane.f32.xlu0 %v513_v39 }
 0x3f9   :  { %v515_v46 = vpop.xlane.xlu0 %514 }
 0x3fa   :  { %v516_v47 = vmul.f32 0.0625, %v515_v46  ;;  %v2686_v46 = vpack.c.bf16 %v2342_v45, %v2341_v44 }
 0x3fc   :  { %v517_v48 = vadd.f32 1e-05, %v516_v47  ;;  %v2346_v47 = vld [vmem:[%s2961_s12 + $0x20] sm:$0xff] }
 0x3fe   :  { %2790 = vrsqrt.f32 %v517_v48  ;;  %v2347_v48 = vld [vmem:[%s2961_s12 + $0x28] sm:$0xff] }
 0x408   :  { %v2791_v49 = vpop.eup %2790 }
 0x409   :  { %v519_v51 = vmul.f32 %v2791_v49, %v511_v37  ;;  %v2689_v49 = vpack.c.bf16 %v2347_v48, %v2346_v47 }
 0x40b   :  { %v526_v53 = vmul.f32 %v2319_v50, %v519_v51 }
 0x40d   :  { %v533_v54 = vadd.f32 %v2320_v52, %v526_v53 }
 0x40f   :  { %2523 = vmatmul.mubr.msk.f32.vlgmr.msra.gmra.mrb[2].mxu0 %vm177_vm1, %v533_v54 }
 0x410   :  { %2540 = vmatprep.mubr.msk.f32.mxu0 %vm2878_vm0, %v2879_v6  ;;  %2681 = vmatpush3.bf16.msra.mxu0 %v2680_v15 }
 0x411   :  { %2682 = vmatprep.subr.bf16.mxu0 %v2877_v4 }
 0x4e2   :  { %v612_v59 = vpop.f32.mrb[2].mxu0 }
 0x4e3   :  { %v613_v60 = vadd.f32 %v2321_v58, %v612_v59  ;;  %v2524_v61 = vpop.f32.mrb[3].mxu0  ;;  %v2340_v58 = vld [vmem:[%s2946_s24 + $0x1] ss:$0 sm:$0xff]  ;;  %s3373_s24 = sld [smem:[#allocation16_spill]] }
 0x4e5   :  { %v616_v62 = vmax.f32 %v613_v60, 0.0  ;;  %v2695_v60 = vpack.c.bf16 %v1136_v57, %v1135_v56 }
 0x4e7   :  { %2534 = vmatmul.mubr.msk.f32.vlgmr.msra.gmra.mrb[6].mxu1 %vm628_vm6, %v616_v62  ;;  %v2312_v62 = vld [vmem:[%s3367_s21] ss:$0 sm:$0xff] }
 0x4e8   :  { %2554 = vmatprep.mubr.msk.f32.mxu1 %vm2878_vm0, %v2879_v6  ;;  %2687 = vmatpush3.bf16.msra.mxu1 %v2686_v46 }
 0x4e9   :  { %2694 = vmatprep.subr.bf16.mxu1 %v2877_v4 }
 0x5ba   :  { %v698_v0 = vpop.f32.mrb[6].mxu1 }
 0x5bb   :  { %v699_v1 = vadd.f32 %v2323_v63, %v698_v0  ;;  %v2535_v2 = vpop.f32.mrb[7].mxu1  ;;  %v336_v63 = vadd.f32 %v2312_v62, %v3120_v23  ;;  %v2348_v0 = vld [vmem:[%s2961_s12 + $0x30] sm:$0xff]  ;;  %v2344_v23 = vld [vmem:[%s3362_s0 + $0x1] ss:$0 sm:$0xff] }
 0x5bd   :  { %v702_v3 = vadd.f32 %v699_v1, %v533_v54  ;;  %v2339_v54 = vld [vmem:[%s2941_s19 + $0x1] ss:$0 sm:$0xff]  ;;  %v2349_v1 = vld [vmem:[%s2961_s12 + $0x38] sm:$0xff]  ;;  %s3372_s19 = sld [smem:[#allocation20_spill]]  ;;  %s3376_s12 = sld [smem:[#allocation21_spill]] }
 0x5be   :  { %v2692_v2 = vpack.c.bf16 %v2349_v1, %v2348_v0 }
 0x5bf   :  { %v705_v5 = vsel %vm177_vm1, %v702_v3, 0.0 }
 0x5c0   :  { %706 = vadd.xlane.f32.xlu1 %v705_v5  ;;  %v1221_v5 = vld [vmem:[%s3368_s29 + $0x8] sm:$0xf] }
 0x5c3   :  { %v1424_v46 = vld [vmem:[%s3372_s19 + $0x10] sm:$0xff]  ;;  %v1425_v47 = vld [vmem:[%s3372_s19 + $0x18] sm:$0xff] }
 0x5c4   :  { %v2710_v48 = vpack.c.bf16 %v1425_v47, %v1424_v46 }
 0x64d   :  { %v707_v7 = vpop.xlane.xlu1 %706 }
 0x64e   :  { %v708_v8 = vmul.f32 0.0625, %v707_v7 }
 0x650   :  { %v709_v9 = vsub.f32 %v702_v3, %v708_v8  ;;  %v1220_v3 = vld [vmem:[%s3368_s29] sm:$0xff] }
 0x651   :  { %v2699_v7 = vpack.c.bf16 %v1221_v5, %v1220_v3  ;;  %v2373_v3 = vld [vmem:[%s3366_s17 + $0x18] sm:$0xf] }
 0x652   :  { %v710_v10 = vmul.f32 %v709_v9, %v709_v9 }
 0x654   :  { %v711_v11 = vsel %vm177_vm1, %v710_v10, 0.0 }
 0x655   :  { %712 = vadd.xlane.f32.xlu1 %v711_v11  ;;  %v2357_v11 = vld [vmem:[%s3369_s3] ss:$0 sm:$0xff] }
 0x6e2   :  { %v713_v16 = vpop.xlane.xlu1 %712 }
 0x6e3   :  { %v714_v17 = vmul.f32 0.0625, %v713_v16 }
 0x6e5   :  { %v715_v18 = vadd.f32 1e-05, %v714_v17 }
 0x6e7   :  { %2792 = vrsqrt.f32 %v715_v18  ;;  %v2360_v18 = vld [vmem:[%s3370_s8] ss:$0 sm:$0xff] }
 0x6f1   :  { %v2793_v19 = vpop.eup %2792 }
 0x6f2   :  { %v717_v21 = vmul.f32 %v2793_v19, %v709_v9 }
 0x6f4   :  { %v724_v26 = vmul.f32 %v2325_v20, %v717_v21 }
 0x6f6   :  { %v731_v28 = vadd.f32 %v2326_v25, %v724_v26 }
 0x6f8   :  { %2541 = vmatmul.mubr.msk.f32.vlgmr.msra.gmra.mrb[4].mxu0 %vm177_vm1, %v731_v28 }
 0x6f9   :  { %2684 = vmatpush3.bf16.msra.mxu0 %v2683_v27  ;;  %2547 = vmatprep.mubr.msk.f32.mxu0 %vm2878_vm0, %v2879_v6 }
 0x6fa   :  { %2688 = vmatprep.subr.bf16.mxu0 %v2877_v4 }
 0x7cb   :  { %v812_v30 = vpop.f32.mrb[4].mxu0 }
 0x7cc   :  { %v813_v31 = vadd.f32 %v2330_v29, %v812_v30  ;;  %v2542_v32 = vpop.f32.mrb[5].mxu0 }
 0x7cd   :  { %v1337_v32 = vld [vmem:[%s3371_s14 + $0x8] sm:$0xf] }
 0x7ce   :  { %2548 = vmatmul.mubr.msk.f32.vlgmr.msra.gmra.mrb[6].mxu0 %vm177_vm1, %v813_v31  ;;  %v1336_v31 = vld [vmem:[%s3371_s14] sm:$0xff] }
 0x7cf   :  { %2565 = vmatprep.mubr.msk.f32.mxu0 %vm2878_vm0, %v2879_v6  ;;  %2690 = vmatpush3.bf16.msra.mxu0 %v2689_v49  ;;  %v2365_v49 = vld [vmem:[%s3375_s6] ss:$0 sm:$0xff] }
 0x7d0   :  { %2691 = vmatprep.subr.bf16.mxu0 %v2877_v4 }
 0x7d3   :  { %2693 = vmatpush3.bf16.msra.mxu0 %v2692_v2  ;;  %v2372_v2 = vld [vmem:[%s3366_s17 + $0x10] sm:$0xff] }
 0x7d4   :  { %2702 = vmatprep.subr.bf16.mxu0 %v2877_v4  ;;  %v2713_v5 = vpack.c.bf16 %v2373_v3, %v2372_v2  ;;  %v2355_v2 = vld [vmem:[%s3364_s9 + $0x1] ss:$0 sm:$0xff] }
 0x8a1   :  { %v896_v34 = vpop.f32.mrb[6].mxu0 }
 0x8a2   :  { %v897_v35 = vadd.f32 %v2335_v33, %v896_v34  ;;  %v2549_v36 = vpop.f32.mrb[7].mxu0  ;;  %v2703_v33 = vpack.c.bf16 %v1337_v32, %v1336_v31  ;;  %v1422_v34 = vld [vmem:[%s3372_s19] sm:$0xff] }
 0x8a3   :  { %v2351_v31 = vld [vmem:[%s3363_s5 + $0x1] ss:$0 sm:$0xff] }
 0x8a4   :  { %v900_v37 = vadd.f32 %v897_v35, %v731_v28  ;;  %v1423_v35 = vld [vmem:[%s3372_s19 + $0x8] sm:$0xff] }
 0x8a5   :  { %v2707_v36 = vpack.c.bf16 %v1423_v35, %v1422_v34 }
 0x8a6   :  { %v905_v38 = vsel %vm177_vm1, %v900_v37, 0.0 }
 0x8a7   :  { %906 = vadd.xlane.f32.xlu0 %v905_v38 }
 0x934   :  { %v907_v39 = vpop.xlane.xlu0 %906 }
 0x935   :  { %v908_v40 = vmul.f32 0.0625, %v907_v39 }
 0x937   :  { %v909_v41 = vsub.f32 %v900_v37, %v908_v40 }
 0x939   :  { %v910_v42 = vmul.f32 %v909_v41, %v909_v41 }
 0x93b   :  { %v911_v43 = vsel %vm177_vm1, %v910_v42, 0.0 }
 0x93c   :  { %912 = vadd.xlane.f32.xlu1 %v911_v43  ;;  %v2364_v43 = vld [vmem:[%s3374_s30] ss:$0 sm:$0xff] }
 0x9c9   :  { %v913_v50 = vpop.xlane.xlu1 %912 }
 0x9ca   :  { %v914_v51 = vmul.f32 0.0625, %v913_v50 }
 0x9cc   :  { %v915_v52 = vadd.f32 1e-05, %v914_v51 }
 0x9ce   :  { %2794 = vrsqrt.f32 %v915_v52 }
 0x9d8   :  { %v2795_v53 = vpop.eup %2794 }
 0x9d9   :  { %v917_v55 = vmul.f32 %v2795_v53, %v909_v41  ;;  %v2363_v41 = vld [vmem:[%s3373_s24] ss:$0 sm:$0xff] }
 0x9db   :  { %v924_v59 = vmul.f32 %v2339_v54, %v917_v55  ;;  %v2368_v54 = vld [vmem:[%s3376_s12] ss:$0 sm:$0xff] }
 0x9dd   :  { %v3178_v61 = vadd.f32 %v2340_v58, %v924_v59 }
 0x9df   :  { %2555 = vmatmul.mubr.msk.f32.vlgmr.msra.gmra.mrb[8].mxu1 %vm177_vm1, %v3178_v61 }
 0x9e0   :  { %2697 = vmatpush3.bf16.msk.msra.mxu1 %vm3102_vm4, %v2695_v60  ;;  %2572 = vmatprep.mubr.msk.f32.mxu1 %vm2878_vm0, %v2879_v6 }
 0x9e1   :  { %2698 = vmatprep.subr.bf16.mxu1 %v2877_v4 }
 0x9e3   :  { %2573 = vmatmul.mubr.msk.f32.vlgmr.msra.gmra.mrb[10].mxu1 %vm261_vm5, %v336_v63 }
 0x9e4   :  { %2579 = vmatprep.mubr.msk.f32.mxu1 %vm2878_vm0, %v2879_v6  ;;  %2701 = vmatpush3.bf16.msk.msra.mxu1 %vm3102_vm4, %v2699_v7 }
 0x9e5   :  { %2706 = vmatprep.subr.bf16.mxu1 %v2877_v4 }
 0xab2   :  { %v1012_v8 = vpop.f32.mrb[8].mxu1 }
 0xab3   :  { %v1013_v9 = vadd.f32 %v2344_v23, %v1012_v8  ;;  %v2556_v10 = vpop.f32.mrb[9].mxu1 }
 0xab4   :  { %v2370_v10 = vld [vmem:[%s3377_s20] ss:$0 sm:$0xff] }
 0xab5   :  { %v1016_v12 = vmax.f32 %v1013_v9, 0.0 }
 0xab6   :  { %v1216_v13 = vpop.f32.mrb[10].mxu1 }
 0xab7   :  { %v1217_v15 = vadd.f32 %v2357_v11, %v1216_v13  ;;  %2566 = vmatmul.mubr.msk.f32.vlgmr.msra.gmra.mrb[8].mxu0 %vm628_vm6, %v1016_v12  ;;  %v2574_v16 = vpop.f32.mrb[11].mxu1  ;;  %v2378_v12 = vld [vmem:[%s3368_s29 + $0x10] sm:$0xff]  ;;  %v2379_v13 = vld [vmem:[%s3368_s29 + $0x18] sm:$0xf] }
 0xab8   :  { %2586 = vmatprep.mubr.msk.f32.mxu0 %vm2878_vm0, %v2879_v6  ;;  %2705 = vmatpush3.bf16.msk.msra.mxu0 %vm3102_vm4, %v2703_v33 }
 0xab9   :  { %2580 = vmatmul.mubr.msk.f32.vlgmr.msra.gmra.mrb[12].mxu1 %vm261_vm5, %v1217_v15  ;;  %2712 = vmatprep.subr.bf16.mxu0 %v2877_v4  ;;  %v2371_v15 = vld [vmem:[%s3378_s22] ss:$0 sm:$0xff] }
 0xaba   :  { %2597 = vmatprep.mubr.msk.f32.mxu1 %vm2878_vm0, %v2879_v6  ;;  %2708 = vmatpush3.bf16.msra.mxu1 %v2707_v36 }
 0xabb   :  { %2709 = vmatprep.subr.bf16.mxu1 %v2877_v4 }
 0xabe   :  { %2711 = vmatpush3.bf16.msra.mxu1 %v2710_v48 }
 0xabf   :  { %2720 = vmatprep.subr.bf16.mxu1 %v2877_v4 }
 0xb8a   :  { %v3208_v17 = vpop.f32.mrb[8].mxu0 }
 0xb8b   :  { %v2567_v19 = vpop.f32.mrb[9].mxu0  ;;  %v1100_v34 = vadd.f32 %v2351_v31, %v3208_v17 }
 0xb8c   :  { %v1301_v20 = vpop.f32.mrb[12].mxu1 }
 0xb8d   :  { %v1302_v21 = vadd.f32 %v2360_v18, %v1301_v20  ;;  %v2581_v22 = vpop.f32.mrb[13].mxu1  ;;  %v2717_v18 = vpack.c.bf16 %v2379_v13, %v2378_v12  ;;  %v2375_v20 = vld [vmem:[%s3369_s3 + $0x1] ss:$0 sm:$0xff] }
 0xb8e   :  { %v2391_v12 = vld [vmem:[%s3375_s6 + $0x1] ss:$0 sm:$0xff] }
 0xb8f   :  { %v1305_v24 = vadd.f32 %v1302_v21, %v336_v63 }
 0xb91   :  { %v1308_v25 = vsel %vm261_vm5, %v1305_v24, 0.0 }
 0xb92   :  { %1309 = vadd.xlane.f32.xlu0 %v1308_v25  ;;  %v2381_v25 = vld [vmem:[%s3370_s8 + $0x1] ss:$0 sm:$0xff] }
 0xc1f   :  { %v1310_v26 = vpop.xlane.xlu0 %1309 }
 0xc20   :  { %v1312_v27 = vmul.f32 0.083333336, %v1310_v26 }
 0xc22   :  { %v1313_v28 = vsub.f32 %v1305_v24, %v1312_v27 }
 0xc24   :  { %v1314_v29 = vmul.f32 %v1313_v28, %v1313_v28 }
 0xc26   :  { %v1315_v30 = vsel %vm261_vm5, %v1314_v29, 0.0 }
 0xc27   :  { %1316 = vadd.xlane.f32.xlu1 %v1315_v30 }
 0xcb4   :  { %v1317_v37 = vpop.xlane.xlu1 %1316 }
 0xcb5   :  { %v1318_v38 = vmul.f32 0.083333336, %v1317_v37 }
 0xcb7   :  { %v1319_v39 = vadd.f32 1e-05, %v1318_v38  ;;  %v1103_v38 = vadd.f32 %v1100_v34, %v3178_v61 }
 0xcb9   :  { %2796 = vrsqrt.f32 %v1319_v39  ;;  %v1108_v39 = vsel %vm177_vm1, %v1103_v38, 0.0 }
 0xcc3   :  { %v2797_v40 = vpop.eup %2796 }
 0xcc4   :  { %v1321_v42 = vmul.f32 %v2797_v40, %v1313_v28  ;;  %v2388_v40 = vld [vmem:[%s3371_s14 + $0x10] sm:$0xff] }
 0xcc6   :  { %v1328_v44 = vmul.f32 %v2363_v41, %v1321_v42  ;;  %v2389_v41 = vld [vmem:[%s3371_s14 + $0x18] sm:$0xf] }
 0xcc7   :  { %v2721_v42 = vpack.c.bf16 %v2389_v41, %v2388_v40 }
 0xcc8   :  { %v1335_v45 = vadd.f32 %v2364_v43, %v1328_v44 }
 0xcca   :  { %2587 = vmatmul.mubr.msk.f32.vlgmr.msra.gmra.mrb[10].mxu0 %vm261_vm5, %v1335_v45 }
 0xccb   :  { %2604 = vmatprep.mubr.msk.f32.mxu0 %vm2878_vm0, %v2879_v6  ;;  %2715 = vmatpush3.bf16.msk.msra.mxu0 %vm3102_vm4, %v2713_v5  ;;  %v2356_v5 = vld [vmem:[%s3365_s13 + $0x1] ss:$0 sm:$0xff] }
 0xccc   :  { %2716 = vmatprep.subr.bf16.mxu0 %v2877_v4 }
 0xd9d   :  { %v1417_v50 = vpop.f32.mrb[10].mxu0 }
 0xd9e   :  { %v1418_v51 = vadd.f32 %v2365_v49, %v1417_v50  ;;  %v2588_v52 = vpop.f32.mrb[11].mxu0  ;;  %v2386_v50 = vld [vmem:[%s3373_s24 + $0x1] ss:$0 sm:$0xff] }
 0xd9f   :  { %v2387_v52 = vld [vmem:[%s3374_s30 + $0x1] ss:$0 sm:$0xff] }
 0xda0   :  { %v1421_v53 = vmax.f32 %v1418_v51, 0.0 }
 0xda2   :  { %2598 = vmatmul.mubr.msk.f32.vlgmr.msra.gmra.mrb[14].mxu1 %vm628_vm6, %v1421_v53 }
 0xda3   :  { %2618 = vmatprep.mubr.msk.f32.mxu1 %vm2878_vm0, %v2879_v6  ;;  %2723 = vmatpush3.bf16.msk.msra.mxu1 %vm3102_vm4, %v2721_v42  ;;  %v2403_v42 = vld [vmem:[%s3377_s20 + $0x1] ss:$0 sm:$0xff] }
 0xda4   :  { %2730 = vmatprep.subr.bf16.mxu1 %v2877_v4 }
 0xe75   :  { %v1502_v55 = vpop.f32.mrb[14].mxu1 }
 0xe76   :  { %v1503_v56 = vadd.f32 %v2368_v54, %v1502_v55  ;;  %v2599_v57 = vpop.f32.mrb[15].mxu1  ;;  %v2394_v55 = vld [vmem:[%s3372_s19 + $0x20] sm:$0xff] }
 0xe78   :  { %v1506_v58 = vadd.f32 %v1503_v56, %v1335_v45  ;;  %v2395_v56 = vld [vmem:[%s3372_s19 + $0x28] sm:$0xff] }
 0xe79   :  { %v2725_v57 = vpack.c.bf16 %v2395_v56, %v2394_v55 }
 0xe7a   :  { %v1509_v59 = vsel %vm261_vm5, %v1506_v58, 0.0 }
 0xe7b   :  { %1510 = vadd.xlane.f32.xlu0 %v1509_v59  ;;  %v2397_v59 = vld [vmem:[%s3372_s19 + $0x38] sm:$0xff] }
 0xf08   :  { %v1511_v60 = vpop.xlane.xlu0 %1510 }
 0xf09   :  { %v1512_v62 = vmul.f32 0.083333336, %v1511_v60 }
 0xf0b   :  { %v1513_v63 = vsub.f32 %v1506_v58, %v1512_v62  ;;  %v2396_v58 = vld [vmem:[%s3372_s19 + $0x30] sm:$0xff] }
 0xf0c   :  { %v2728_v60 = vpack.c.bf16 %v2397_v59, %v2396_v58  ;;  %v2010_v58 = vld [vmem:[%s3381_s28] sm:$0xff]  ;;  %v2011_v59 = vld [vmem:[%s3381_s28 + $0x8] sm:$0xff] }
 0xf0d   :  { %v1514_v0 = vmul.f32 %v1513_v63, %v1513_v63 }
 0xf0f   :  { %v1515_v1 = vsel %vm261_vm5, %v1514_v0, 0.0 }
 0xf10   :  { %1516 = vadd.xlane.f32.xlu1 %v1515_v1 }
 0xf9d   :  { %v1517_v7 = vpop.xlane.xlu1 %1516 }
 0xf9e   :  { %v1518_v23 = vmul.f32 0.083333336, %v1517_v7 }
 0xfa0   :  { %v1519_v8 = vadd.f32 1e-05, %v1518_v23  ;;  %v2405_v23 = vld [vmem:[%s3379_s26] ss:$0 sm:$0xff] }
 0xfa2   :  { %2798 = vrsqrt.f32 %v1519_v8 }
 0xfac   :  { %v2799_v9 = vpop.eup %2798 }
 0xfad   :  { %v1521_v11 = vmul.f32 %v2799_v9, %v1513_v63 }
 0xfaf   :  { %v1528_v16 = vmul.f32 %v2370_v10, %v1521_v11  ;;  %v2881_v11 = vmov 0  }
 0xfb0   :  { %2789 = vset.pattern.permute.xlu1 %v2881_v11  ;;  %2788 = vset.pattern.permute.xlu0 %v2881_v11 }
 0xfb1   :  { %v1535_v19 = vadd.f32 %v2371_v15, %v1528_v16 }
 0xfb3   :  { %2605 = vmatmul.mubr.msk.f32.vlgmr.msra.gmra.mrb[12].mxu0 %vm261_vm5, %v1535_v19 }
 0xfb4   :  { %2719 = vmatpush3.bf16.msk.msra.mxu0 %vm3102_vm4, %v2717_v18  ;;  %2611 = vmatprep.mubr.msk.f32.mxu0 %vm2878_vm0, %v2879_v6 }
 0xfb5   :  { %2724 = vmatprep.subr.bf16.mxu0 %v2877_v4 }
0x1086   :  { %v1619_v21 = vpop.f32.mrb[12].mxu0 }
0x1087   :  { %v1620_v22 = vadd.f32 %v2375_v20, %v1619_v21  ;;  %v2606_v24 = vpop.f32.mrb[13].mxu0 }
0x1089   :  { %2612 = vmatmul.mubr.msk.f32.vlgmr.msra.gmra.mrb[14].mxu0 %vm261_vm5, %v1620_v22 }
0x108a   :  { %2629 = vmatprep.mubr.msk.f32.mxu0 %vm2878_vm0, %v2879_v6  ;;  %2726 = vmatpush3.bf16.msra.mxu0 %v2725_v57 }
0x108b   :  { %2727 = vmatprep.subr.bf16.mxu0 %v2877_v4 }
0x108e   :  { %2729 = vmatpush3.bf16.msra.mxu0 %v2728_v60  ;;  %v2735_v60 = vpack.c.bf16 %v2011_v59, %v2010_v58 }
0x108f   :  { %2737 = vmatprep.subr.bf16.mxu0 %v2877_v4 }
0x115c   :  { %v1706_v26 = vpop.f32.mrb[14].mxu0 }
0x115d   :  { %v1707_v27 = vadd.f32 %v2381_v25, %v1706_v26  ;;  %v2613_v28 = vpop.f32.mrb[15].mxu0 }
0x115f   :  { %v1710_v29 = vadd.f32 %v1707_v27, %v1535_v19  ;;  %v2406_v19 = vld [vmem:[#allocation2] ss:$0 sm:$0xff]  ;;  %v2399_v27 = vld [vmem:[%s3376_s12 + $0x1] ss:$0 sm:$0xff] }
0x1161   :  { %v1715_v30 = vsel %vm261_vm5, %v1710_v29, 0.0 }
0x1162   :  { %1716 = vadd.xlane.f32.xlu0 %v1715_v30 }
0x11ef   :  { %v1717_v32 = vpop.xlane.xlu0 %1716 }
0x11f0   :  { %v1718_v33 = vmul.f32 0.083333336, %v1717_v32 }
0x11f2   :  { %v1719_v35 = vsub.f32 %v1710_v29, %v1718_v33 }
0x11f4   :  { %v1720_v36 = vmul.f32 %v1719_v35, %v1719_v35 }
0x11f6   :  { %v1721_v37 = vsel %vm261_vm5, %v1720_v36, 0.0 }
0x11f7   :  { %1722 = vadd.xlane.f32.xlu1 %v1721_v37 }
0x11fb   :  { %1109 = vadd.xlane.f32.xlu1 %v1108_v39 }
0x1284   :  { %v1723_v17 = vpop.xlane.xlu1 %1722 }
0x1285   :  { %v1724_v43 = vmul.f32 0.083333336, %v1723_v17 }
0x1287   :  { %v1725_v44 = vadd.f32 1e-05, %v1724_v43  ;;  %v2404_v43 = vld [vmem:[%s3378_s22 + $0x1] ss:$0 sm:$0xff] }
0x1288   :  { %v1110_v45 = vpop.xlane.xlu1 %1109 }
0x1289   :  { %2800 = vrsqrt.f32 %v1725_v44  ;;  %v1111_v61 = vmul.f32 0.0625, %v1110_v45  ;;  %v2408_v45 = vld [vmem:[%s3380_s1] ss:$0 sm:$0xff] }
0x128b   :  { %v1112_v46 = vsub.f32 %v1103_v38, %v1111_v61 }
0x128d   :  { %v1113_v47 = vmul.f32 %v1112_v46, %v1112_v46 }
0x128f   :  { %v1114_v48 = vsel %vm177_vm1, %v1113_v47, 0.0 }
0x1290   :  { %1115 = vadd.xlane.f32.xlu1 %v1114_v48  ;;  %v2012_v48 = vld [vmem:[%s3059_s25] sm:$0xff] }
0x1293   :  { %v2801_v49 = vpop.eup %2800 }
0x1294   :  { %v1727_v51 = vmul.f32 %v2801_v49, %v1719_v35  ;;  %v2013_v49 = vld [vmem:[%s3059_s25 + $0x8] sm:$0xf]  ;;  %s3382_s25 = sld [smem:[#allocation27_spill]] }
0x1296   :  { %v1734_v53 = vmul.f32 %v2386_v50, %v1727_v51  ;;  %v2731_v50 = vpack.c.bf16 %v2013_v49, %v2012_v48  ;;  %v2409_v51 = vld [vmem:[#allocation3] ss:$0 sm:$0xff] }
0x1298   :  { %v1741_v54 = vadd.f32 %v2387_v52, %v1734_v53 }
0x129a   :  { %2619 = vmatmul.mubr.msk.f32.vlgmr.msra.gmra.mrb[16].mxu1 %vm261_vm5, %v1741_v54 }
0x129b   :  { %2636 = vmatprep.mubr.msk.f32.mxu1 %vm2878_vm0, %v2879_v6  ;;  %2733 = vmatpush3.bf16.msk.msra.mxu1 %vm3102_vm4, %v2731_v50 }
0x129c   :  { %2734 = vmatprep.subr.bf16.mxu1 %v2877_v4 }
0x131d   :  { %v1116_v62 = vpop.xlane.xlu1 %1115 }
0x131e   :  { %v1117_v63 = vmul.f32 0.0625, %v1116_v62 }
0x1320   :  { %v1118_v0 = vadd.f32 1e-05, %v1117_v63 }
0x1322   :  { %2802 = vrsqrt.f32 %v1118_v0 }
0x132c   :  { %v2803_v1 = vpop.eup %2802 }
0x132d   :  { %v1120_v3 = vmul.f32 %v2803_v1, %v1112_v46  ;;  %v2172_v1 = vld [vmem:[%s3069_s27] sm:$0xff] }
0x132f   :  { %v1127_v7 = vmul.f32 %v2355_v2, %v1120_v3  ;;  %v2173_v2 = vld [vmem:[%s3069_s27 + $0x8] sm:$0xff] }
0x1330   :  { %v2738_v3 = vpack.c.bf16 %v2173_v2, %v2172_v1 }
0x1331   :  { %v3282_v8 = vadd.f32 %v2356_v5, %v1127_v7  ;;  %v2174_v5 = vld [vmem:[%s3069_s27 + $0x10] sm:$0xff]  ;;  %v2175_v7 = vld [vmem:[%s3069_s27 + $0x18] sm:$0xff]  ;;  %s2814_s27 = scalar_lea.vmem %s2264_s10, 128 }
0x1332   :  { %p2815_p0 = scmp.ne.s32.totalorder %s2264_s10, %s2814_s27  ;;  %p2820_p2 = scmp.lt.s32.totalorder %s2814_s27, %s2814_s27 }
0x1333   :  { %v1955_v9 = vmul.f32 %v2405_v23, %v3282_v8  ;;  %v2741_v23 = vpack.c.bf16 %v2175_v7, %v2174_v5 }
0x1334   :  { %p2821_p3 = por %p2820_p2, %p2819_p1 }
0x1335   :  { %v1956_v10 = vsel %vm177_vm1, %v1955_v9, 0.0 }
0x1336   :  { %1957 = vadd.xlane.f32.xlu1 %v1956_v10  ;;  %p2822_p4 = pnand %p2821_p3, %p2815_p0 }
0x136d   :  { %v1825_v13 = vpop.f32.mrb[16].mxu1 }
0x136e   :  { %v1826_v15 = vadd.f32 %v2391_v12, %v1825_v13  ;;  %v2620_v16 = vpop.f32.mrb[17].mxu1  ;;  %v2414_v12 = vld [vmem:[%s3382_s25] ss:$0 sm:$0xff] }
0x136f   :  { %v2415_v16 = vld [vmem:[%s3074_s4] ss:$0 sm:$0xff] }
0x1370   :  { %v1829_v18 = vmax.f32 %v1826_v15, 0.0 }
0x1372   :  { %2630 = vmatmul.mubr.msk.f32.vlgmr.msra.gmra.mrb[16].mxu0 %vm628_vm6, %v1829_v18 }
0x1373   :  { %2654 = vmatprep.mubr.msk.f32.mxu0 %vm2878_vm0, %v2879_v6  ;;  %2739 = vmatpush3.bf16.msra.mxu0 %v2738_v3 }
0x1374   :  { %2740 = vmatprep.subr.bf16.mxu0 %v2877_v4 }
0x1377   :  { %2742 = vmatpush3.bf16.msra.mxu0 %v2741_v23 }
0x13c3   :  { %v1958_v20 = vpop.xlane.xlu1 %1957 }
0x13c4   :  { %v1966_v21 = vadd.f32 %v2406_v19, %v1958_v20 }
0x13c6   :  { %v2407_v22 = vmul.f32 -1.442695, %v1966_v21 }
0x13c8   :  { %2804 = vpow2.f32 %v2407_v22 }
0x13d2   :  { %v2805_v24 = vpop.eup %2804 }
0x13d3   :  { %v1970_v25 = vadd.f32 1.0, %v2805_v24 }
0x13d5   :  { %2806 = vrcp.f32 %v1970_v25 }
0x13df   :  { %v2807_v26 = vpop.eup %2806 }
0x13e0   :  { %2000 = vperm.xlu1 %2789, %v2807_v26  }
0x1445   :  { %v1912_v28 = vpop.f32.mrb[16].mxu0 }
0x1446   :  { %v1913_v29 = vadd.f32 %v2399_v27, %v1912_v28  ;;  %v2631_v30 = vpop.f32.mrb[17].mxu0 }
0x1448   :  { %v1916_v31 = vadd.f32 %v1913_v29, %v1741_v54 }
0x144a   :  { %v1921_v32 = vsel %vm261_vm5, %v1916_v31, 0.0 }
0x144b   :  { %1922 = vadd.xlane.f32.xlu0 %v1921_v32 }
0x145f   :  { %v2001_v63 = vpop.permute.xlu1 %2000 }
0x1460   :  { %v2003_v0 = vmul.f32 %v2001_v63, %v3282_v8 }
0x14d8   :  { %v1923_v33 = vpop.xlane.xlu0 %1922 }
0x14d9   :  { %v1924_v34 = vmul.f32 0.083333336, %v1923_v33 }
0x14db   :  { %v1925_v35 = vsub.f32 %v1916_v31, %v1924_v34 }
0x14dd   :  { %v1926_v36 = vmul.f32 %v1925_v35, %v1925_v35 }
0x14df   :  { %v1927_v37 = vsel %vm261_vm5, %v1926_v36, 0.0 }
0x14e0   :  { %1928 = vadd.xlane.f32.xlu0 %v1927_v37 }
0x156d   :  { %v1929_v38 = vpop.xlane.xlu0 %1928 }
0x156e   :  { %v1930_v39 = vmul.f32 0.083333336, %v1929_v38 }
0x1570   :  { %v1931_v40 = vadd.f32 1e-05, %v1930_v39 }
0x1572   :  { %2808 = vrsqrt.f32 %v1931_v40 }
0x157c   :  { %v2809_v41 = vpop.eup %2808 }
0x157d   :  { %v1933_v17 = vmul.f32 %v2809_v41, %v1925_v35 }
0x157f   :  { %v1940_v44 = vmul.f32 %v2403_v42, %v1933_v17 }
0x1581   :  { %v1947_v61 = vadd.f32 %v2404_v43, %v1940_v44 }
0x1583   :  { %v1980_v46 = vmul.f32 %v2408_v45, %v1947_v61 }
0x1585   :  { %v1981_v47 = vsel %vm261_vm5, %v1980_v46, 0.0 }
0x1586   :  { %1982 = vadd.xlane.f32.xlu0 %v1981_v47 }
0x1613   :  { %v1983_v52 = vpop.xlane.xlu0 %1982 }
0x1614   :  { %v1991_v53 = vadd.f32 %v2409_v51, %v1983_v52 }
0x1616   :  { %v2410_v54 = vmul.f32 -1.442695, %v1991_v53 }
0x1618   :  { %2810 = vpow2.f32 %v2410_v54 }
0x1622   :  { %v2811_v55 = vpop.eup %2810 }
0x1623   :  { %v1995_v56 = vadd.f32 1.0, %v2811_v55 }
0x1625   :  { %2812 = vrcp.f32 %v1995_v56 }
0x162f   :  { %v2813_v57 = vpop.eup %2812 }
0x1630   :  { %2006 = vperm.xlu0 %2788, %v2813_v57  }
0x16af   :  { %v2007_v14 = vpop.permute.xlu0 %2006 }
0x16b0   :  { %v2009_v62 = vmul.f32 %v2007_v14, %v1947_v61 }
0x16b2   :  { %2637 = vmatmul.mubr.msk.f32.vlgmr.msra.gmra.mrb[18].mxu1 %vm261_vm5, %v2009_v62 }
0x16b3   :  { %2736 = vmatpush3.bf16.msra.mxu1 %v2735_v60  ;;  %2643 = vmatprep.mubr.msk.f32.mxu1 %vm2878_vm0, %v2879_v6 }
0x16b6   :  { %2644 = vmatmul.mubr.msk.f32.vlgmr.msra.gmra.mrb[20].mxu1 %vm177_vm1, %v2003_v0 }
0x1785   :  { %v2086_v9 = vpop.f32.mrb[18].mxu1 }
0x1786   :  { %v2638_v10 = vpop.f32.mrb[19].mxu1 }
0x1789   :  { %v2159_v11 = vpop.f32.mrb[20].mxu1 }
0x178a   :  { %v2160_v6 = vadd.f32 %v2159_v11, %v2086_v9  ;;  %v2645_v13 = vpop.f32.mrb[21].mxu1 }
0x178c   :  { %v2170_v8 = vadd.f32 %v2414_v12, %v2160_v6 }
0x178e   :  { %v2171_v15 = vmax.f32 %v2170_v8, 0.0 }
0x1790   :  { %2655 = vmatmul.mubr.msk.f32.vlgmr.msra.gmra.mrb[18].mxu0 %vm628_vm6, %v2171_v15 }
0x1863   :  { %v2252_v18 = vpop.f32.mrb[18].mxu0 }
0x1864   :  { %v2253_v19 = vadd.f32 %v2415_v16, %v2252_v18  ;;  %v2656_v4 = vpop.f32.mrb[19].mxu0 }
0x1866   :  { %2256 = vst [vmem:[#allocation4] sm:$0xff] %v2253_v19 }
0x1867   :  { %2825 = shalt.err (!%p2822_p4)
}
0x1868   :  { %s2826_s7 = scalar_lea.hbm %s3079_s15, 128 }
0x1869   :  { %p2827_p5 = scmp.ne.s32.totalorder %s3079_s15, %s2826_s7  ;;  %p2830_p6 = scmp.lt.u32.totalorder %s2826_s7, %s3079_s15 }
0x186b   :  { %p2832_p7 = pnand %p2830_p6, %p2827_p5 }
0x186d   :  { %2835 = shalt.err (!%p2832_p7)
}
0x186e   :  { %2266 = dma.vmem_to_hbm [thread:$0]  %s2264_s10, 128, %s3079_s15, [#allocation5]  }
0x186f   :  { %2836 = dma.done.wait [#allocation5], 128  }
0x1870   :  { %2837 = vsyncadd [#allocation5], 4294967168 }
0x1871   :  { %2270 = vsyncpa [#allocation5], 1 }

</bundles_post_ra>
